<compile_context>
chip_gen: v6e
topology: v6e:2x2x1
jax: 0.10.0
libtpu: 0.0.40
codegen_flags: <defaults>
</compile_context>

<pallas_src>
import numpy as np
import jax
import jax.numpy as jnp
from jax import lax
from jax.experimental import pallas as pl
from jax.experimental.pallas import tpu as pltpu


_TAPS = tuple((oh, ow) for oh in (-1, 0, 1) for ow in (-1, 0, 1))  # t = kh*3 + kw


# ----------------------------------------------------------------------------
# Fused kernel factory.
# ----------------------------------------------------------------------------
def make_fused_kernel(H, W, Cin_p, Cout, B):
    H2, W2 = H // 2, W // 2
    HW1, HW2 = H * W, H2 * W2
    L1, L2 = B * HW1, B * HW2

    def _shift(x, off, L):
        # result[:, p] = x[:, (p + off) % L]; wrap / cross-image lanes are always
        # masked off afterwards.  XLU lane rotation (jnp.roll semantics).
        s = (-off) % L
        return x if s == 0 else pltpu.roll(x, shift=s, axis=1)

    def conv_im2col(x, w_mat, b_full, cmask, w_img, L, pre_relu):
        # x: (C, L) channel-major flat; w_mat: (Cout, 9*C); cmask: (9*C, L) 0/1;
        # b_full: (Cout, L) pre-broadcast bias.
        if pre_relu:
            x = jnp.maximum(x, 0.0)
        cols = [_shift(x, oh * w_img + ow, L) for oh, ow in _TAPS]
        col = jnp.concatenate(cols, axis=0) * cmask            # (9*C, L), zero padding taps
        return jnp.dot(w_mat, col, preferred_element_type=jnp.float32) + b_full

    def kernel(x_ref, wf_ref, wr1_ref, wr2_ref, b_ref,
               cm1_ref, cm2_ref, pneg_ref, sel_ref, o_ref):
        x = x_ref[0]                       # (Cin_p, L1)
        wf = wf_ref[...]                   # (Cout, 9*Cin_p)
        wr1 = wr1_ref[...]                 # (Cout, 9*Cout)
        wr2 = wr2_ref[...]                 # (Cout, 9*Cout)
        cm1 = cm1_ref[...]                 # (9*Cin_p, L1)
        cm2 = cm2_ref[...]                 # (9*Cout, L2)
        pneg = pneg_ref[...]               # (9, L1)  0 / -1e30 additive pool mask
        sel = sel_ref[...]                 # (HW1, HW2) 0/1 stride-2 selection
        b_all = b_ref[...]                 # (Cout, 3)

        # Hoisted bias broadcasts (reused by the unrolled resnet loop).
        bf_full = jnp.broadcast_to(b_all[:, 0:1], (Cout, L1))
        b1_full = jnp.broadcast_to(b_all[:, 1:2], (Cout, L2))
        b2_full = jnp.broadcast_to(b_all[:, 2:3], (Cout, L2))

        # feats_conv: 3x3 conv, stride 1, pad 1 (no activation).
        y = conv_im2col(x, wf, bf_full, cm1, W, L1, pre_relu=False)   # (Cout, L1)

        # MaxPool k3/s2/p1: stride-1 window max via roll + additive -1e30 mask ...
        mx = None
        for t, (oh, ow) in enumerate(_TAPS):
            v = _shift(y, oh * W + ow, L1) + pneg[t:t + 1, :]
            mx = v if mx is None else jnp.maximum(mx, v)
        # ... then stride-2 decimation: one tiny selection matmul per image.
        pieces = [
            jnp.dot(mx[:, b * HW1:(b + 1) * HW1], sel, preferred_element_type=jnp.float32)
            for b in range(B)
        ]
        y = pieces[0] if B == 1 else jnp.concatenate(pieces, axis=1)  # (Cout, L2)

        # resnet1 applied twice with the SAME weights (PyTorch forward calls resnet1 twice).
        for _ in range(2):
            h = conv_im2col(y, wr1, b1_full, cm2, W2, L2, pre_relu=True)
            h = conv_im2col(h, wr2, b2_full, cm2, W2, L2, pre_relu=True)
            y = y + h

        o_ref[0] = y.astype(o_ref.dtype)

    return kernel


# ----------------------------------------------------------------------------
# Host-side constants (computed once at trace time; DMA'd once via constant index_map).
# ----------------------------------------------------------------------------
def _stack_weights(w_hwio):
    # (3,3,Cin,Cout) HWIO -> (Cout, 9*Cin); columns ordered (kh, kw, cin) to match
    # the im2col row ordering (tap-major, channel-minor).
    kh, kw, cin, cout = w_hwio.shape
    return jnp.transpose(w_hwio, (3, 0, 1, 2)).reshape(cout, kh * kw * cin)


def _conv_mask(H, W, C, B):
    # (9*C, B*H*W) float 0/1: 1 where the tap's neighbour is inside the image.
    hw = H * W
    p = np.arange(hw)
    r, c = p // W, p % W
    rows = []
    for oh, ow in _TAPS:
        m = ((r + oh >= 0) & (r + oh < H) & (c + ow >= 0) & (c + ow < W))
        m = np.tile(m.astype(np.float32), B)
        rows.append(np.broadcast_to(m, (C, B * hw)))
    return jnp.asarray(np.concatenate(rows, axis=0))


def _pool_neg_mask(H, W, B):
    # (9, B*H*W) float: 0 where the tap's neighbour is valid, -1e30 otherwise.
    # (Finite sentinel is safe: every k3/s2/p1 window contains its valid centre.)
    hw = H * W
    p = np.arange(hw)
    r, c = p // W, p % W
    rows = []
    for oh, ow in _TAPS:
        valid = ((r + oh >= 0) & (r + oh < H) & (c + ow >= 0) & (c + ow < W))
        rows.append(np.tile(np.where(valid, 0.0, -1e30).astype(np.float32), B))
    return jnp.asarray(np.stack(rows, axis=0))


def _pool_selection_matrix(H, W):
    # S[p, q] = 1 where stride-1-max position p feeds pooled output q (even rows/cols).
    H2, W2 = H // 2, W // 2
    q = np.arange(H2 * W2)
    p = (2 * (q // W2)) * W + 2 * (q % W2)
    S = np.zeros((H * W, H2 * W2), np.float32)
    S[p, q] = 1.0
    return jnp.asarray(S)


# ----------------------------------------------------------------------------
# Wrapper: layout plumbing only (tiny host-side transposes / pads, no compute).
# ----------------------------------------------------------------------------
def convnet_block_forward(x_nchw, params, *, batch_block=2):
    N, Cin, H, W = x_nchw.shape
    Cout = params["feats_w"].shape[-1]
    H2, W2 = H // 2, W // 2
    HW1, HW2 = H * W, H2 * W2

    # Images per grid step: largest divisor of N <= batch_block.  B*HW2 should be a
    # multiple of 128 for a lane-dense output store (B>=2 at 16x16); for larger N
    # the grid still has >=2 steps so both v7x TensorCores get work.
    B = max(1, min(batch_block, N))
    while N % B:
        B -= 1
    G = N // B
    L1, L2 = B * HW1, B * HW2
    Cin_p = -(-Cin // 8) * 8          # pad input channels to a sublane multiple

    # Interleave B images into the lane axis: (N,Cin,H,W) -> (G, Cin_p, B*H*W).
    xg = x_nchw.reshape(G, B, Cin, HW1).transpose(0, 2, 1, 3).reshape(G, Cin, L1)
    if Cin_p != Cin:
        xg = jnp.pad(xg, ((0, 0), (0, Cin_p - Cin), (0, 0)))

    feats_w = params["feats_w"]
    if Cin_p != Cin:
        feats_w = jnp.pad(feats_w, ((0, 0), (0, 0), (0, Cin_p - Cin), (0, 0)))
    wf = _stack_weights(feats_w)                               # (Cout, 9*Cin_p)
    w1, b1, w2, b2 = params["res1"]
    wr1, wr2 = _stack_weights(w1), _stack_weights(w2)          # (Cout, 9*Cout)
    b_all = jnp.stack([params["feats_b"], b1, b2], axis=1)     # (Cout, 3)

    cm1 = _conv_mask(H, W, Cin_p, B)                           # (9*Cin_p, L1)
    cm2 = _conv_mask(H2, W2, Cout, B)                          # (9*Cout, L2)
    pneg = _pool_neg_mask(H, W, B)                             # (9, L1)
    sel = _pool_selection_matrix(H, W)                         # (HW1, HW2)

    kernel = make_fused_kernel(H, W, Cin_p, Cout, B)
    out = pl.pallas_call(
        kernel,
        out_shape=jax.ShapeDtypeStruct((G, Cout, L2), jnp.float32),
        grid=(G,),
        in_specs=[
            pl.BlockSpec((1, Cin_p, L1), lambda g: (g, 0, 0)),
            pl.BlockSpec((Cout, 9 * Cin_p), lambda g: (0, 0)),
            pl.BlockSpec((Cout, 9 * Cout), lambda g: (0, 0)),
            pl.BlockSpec((Cout, 9 * Cout), lambda g: (0, 0)),
            pl.BlockSpec((Cout, 3), lambda g: (0, 0)),
            pl.BlockSpec((9 * Cin_p, L1), lambda g: (0, 0)),
            pl.BlockSpec((9 * Cout, L2), lambda g: (0, 0)),
            pl.BlockSpec((9, L1), lambda g: (0, 0)),
            pl.BlockSpec((HW1, HW2), lambda g: (0, 0)),
        ],
        out_specs=pl.BlockSpec((1, Cout, L2), lambda g: (g, 0, 0)),
        compiler_params=pltpu.CompilerParams(dimension_semantics=("parallel",)),
    )(xg, wf, wr1, wr2, b_all, cm1, cm2, pneg, sel)

    # Undo the lane interleave: (G, Cout, B*HW2) -> (N, Cout, H2, W2).
    out = out.reshape(G, Cout, B, HW2).transpose(0, 2, 1, 3).reshape(N, Cout, H2, W2)
    return out


# ----------------------------------------------------------------------------
# Deterministic parameter init (PyTorch-like uniform(+-1/sqrt(fan_in))).
# ----------------------------------------------------------------------------
def init_params(key, in_ch, num_ch):
    def conv_init(k, cin, cout):
        kw_, kb_ = jax.random.split(k)
        bound = 1.0 / jnp.sqrt(cin * 9.0)
        w = jax.random.uniform(kw_, (3, 3, cin, cout), jnp.float32, -bound, bound)
        b = jax.random.uniform(kb_, (cout,), jnp.float32, -bound, bound)
        return w, b

    k0, k1, k2, k3, k4 = jax.random.split(key, 5)
    feats_w, feats_b = conv_init(k0, in_ch, num_ch)
    r1w1, r1b1 = conv_init(k1, num_ch, num_ch)
    r1w2, r1b2 = conv_init(k2, num_ch, num_ch)
    r2w1, r2b1 = conv_init(k3, num_ch, num_ch)   # resnet2: built but unused in forward (matches PyTorch)
    r2w2, r2b2 = conv_init(k4, num_ch, num_ch)
    return {
        "feats_w": feats_w, "feats_b": feats_b,
        "res1": (r1w1, r1b1, r1w2, r1b2),
        "res2": (r2w1, r2b1, r2w2, r2b2),
    }


# ----------------------------------------------------------------------------
# Pure-JAX reference for verification (same NCHW semantics as PyTorch).
# ----------------------------------------------------------------------------
def _ref_conv(x_nchw, w_hwio, b):
    w_oihw = jnp.transpose(w_hwio, (3, 2, 0, 1))
    y = lax.conv_general_dilated(x_nchw, w_oihw, (1, 1), [(1, 1), (1, 1)],
                                 dimension_numbers=("NCHW", "OIHW", "NCHW"))
    return y + b[None, :, None, None]


def _ref_forward(x, params):
    y = _ref_conv(x, params["feats_w"], params["feats_b"])
    y = lax.reduce_window(y, -jnp.inf, lax.max, (1, 1, 3, 3), (1, 1, 2, 2),
                          [(0, 0), (0, 0), (1, 1), (1, 1)])
    w1, b1, w2, b2 = params["res1"]
    for _ in range(2):
        h = _ref_conv(jnp.maximum(y, 0.0), w1, b1)
        h = _ref_conv(jnp.maximum(h, 0.0), w2, b2)
        y = y + h
    return y


if __name__ == "__main__":
    key = jax.random.PRNGKey(0)
    kx, kp = jax.random.split(key)

    N, C, H, W = 2, 4, 16, 16
    num_ch = 8
    x = jax.random.normal(kx, (N, C, H, W), jnp.float32)
    params = init_params(kp, C, num_ch)

    fwd = jax.jit(convnet_block_forward)
    out = jax.block_until_ready(fwd(x, params))
    assert out.shape == (N, num_ch, H // 2, W // 2), out.shape

    ref = jax.block_until_ready(_ref_forward(x, params))
    if not jnp.allclose(out, ref, rtol=1e-4, atol=1e-4):
        raise AssertionError("Pallas output does not match reference")

    print("KERNEL_OK")
</pallas_src>

<mosaic_0001>
module attributes {stable_mosaic.version = 11 : i64} {
  func.func @kernel(%arg0: i32, %arg1: memref<1x8x512xf32, #tpu.memory_space<vmem>>, %arg2: memref<8x72xf32, #tpu.memory_space<vmem>>, %arg3: memref<8x72xf32, #tpu.memory_space<vmem>>, %arg4: memref<8x72xf32, #tpu.memory_space<vmem>>, %arg5: memref<8x3xf32, #tpu.memory_space<vmem>>, %arg6: memref<72x512xf32, #tpu.memory_space<vmem>>, %arg7: memref<72x128xf32, #tpu.memory_space<vmem>>, %arg8: memref<9x512xf32, #tpu.memory_space<vmem>>, %arg9: memref<256x64xf32, #tpu.memory_space<vmem>>, %arg10: memref<1x8x128xf32, #tpu.memory_space<vmem>>) attributes {dimension_semantics = [#tpu.dimension_semantics<parallel>], iteration_bounds = array<i64: 1>, scalar_prefetch = 0 : i64, scratch_operands = 0 : i64, tpu.core_type = #tpu.core_type<tc>, window_params = [{transform_indices = @transform_0, window_bounds = array<i64: 1, 8, 512>}, {pipeline_mode = #tpu.pipeline_mode<synchronous>, transform_indices = @transform_1, window_bounds = array<i64: 8, 72>}, {pipeline_mode = #tpu.pipeline_mode<synchronous>, transform_indices = @transform_2, window_bounds = array<i64: 8, 72>}, {pipeline_mode = #tpu.pipeline_mode<synchronous>, transform_indices = @transform_3, window_bounds = array<i64: 8, 72>}, {pipeline_mode = #tpu.pipeline_mode<synchronous>, transform_indices = @transform_4, window_bounds = array<i64: 8, 3>}, {pipeline_mode = #tpu.pipeline_mode<synchronous>, transform_indices = @transform_5, window_bounds = array<i64: 72, 512>}, {pipeline_mode = #tpu.pipeline_mode<synchronous>, transform_indices = @transform_6, window_bounds = array<i64: 72, 128>}, {pipeline_mode = #tpu.pipeline_mode<synchronous>, transform_indices = @transform_7, window_bounds = array<i64: 9, 512>}, {pipeline_mode = #tpu.pipeline_mode<synchronous>, transform_indices = @transform_8, window_bounds = array<i64: 256, 64>}, {transform_indices = @transform_9, window_bounds = array<i64: 1, 8, 128>}]} {
    %c0 = arith.constant 0 : index
    %c0_0 = arith.constant 0 : index
    %c0_1 = arith.constant 0 : index
    %0 = vector.load %arg1[%c0, %c0_0, %c0_1] : memref<1x8x512xf32, #tpu.memory_space<vmem>>, vector<1x8x512xf32>
    %1 = vector.shape_cast %0 : vector<1x8x512xf32> to vector<8x512xf32>
    %c0_2 = arith.constant 0 : index
    %c0_3 = arith.constant 0 : index
    %2 = vector.load %arg2[%c0_2, %c0_3] : memref<8x72xf32, #tpu.memory_space<vmem>>, vector<8x72xf32>
    %c0_4 = arith.constant 0 : index
    %c0_5 = arith.constant 0 : index
    %3 = vector.load %arg3[%c0_4, %c0_5] : memref<8x72xf32, #tpu.memory_space<vmem>>, vector<8x72xf32>
    %c0_6 = arith.constant 0 : index
    %c0_7 = arith.constant 0 : index
    %4 = vector.load %arg4[%c0_6, %c0_7] : memref<8x72xf32, #tpu.memory_space<vmem>>, vector<8x72xf32>
    %c0_8 = arith.constant 0 : index
    %c0_9 = arith.constant 0 : index
    %5 = vector.load %arg6[%c0_8, %c0_9] : memref<72x512xf32, #tpu.memory_space<vmem>>, vector<72x512xf32>
    %c0_10 = arith.constant 0 : index
    %c0_11 = arith.constant 0 : index
    %6 = vector.load %arg7[%c0_10, %c0_11] : memref<72x128xf32, #tpu.memory_space<vmem>>, vector<72x128xf32>
    %c0_12 = arith.constant 0 : index
    %c0_13 = arith.constant 0 : index
    %7 = vector.load %arg8[%c0_12, %c0_13] : memref<9x512xf32, #tpu.memory_space<vmem>>, vector<9x512xf32>
    %c0_14 = arith.constant 0 : index
    %c0_15 = arith.constant 0 : index
    %8 = vector.load %arg9[%c0_14, %c0_15] : memref<256x64xf32, #tpu.memory_space<vmem>>, vector<256x64xf32>
    %c0_16 = arith.constant 0 : index
    %c0_17 = arith.constant 0 : index
    %9 = vector.load %arg5[%c0_16, %c0_17] : memref<8x3xf32, #tpu.memory_space<vmem>>, vector<8x3xf32>
    %10 = vector.extract_strided_slice %9 {offsets = [0, 0], sizes = [8, 1], strides = [1, 1]} : vector<8x3xf32> to vector<8x1xf32>
    %11 = vector.shape_cast %10 : vector<8x1xf32> to vector<8x1xf32>
    %12 = vector.broadcast %11 : vector<8x1xf32> to vector<8x512xf32>
    %13 = vector.extract_strided_slice %9 {offsets = [0, 1], sizes = [8, 1], strides = [1, 1]} : vector<8x3xf32> to vector<8x1xf32>
    %14 = vector.shape_cast %13 : vector<8x1xf32> to vector<8x1xf32>
    %15 = vector.broadcast %14 : vector<8x1xf32> to vector<8x128xf32>
    %16 = vector.extract_strided_slice %9 {offsets = [0, 2], sizes = [8, 1], strides = [1, 1]} : vector<8x3xf32> to vector<8x1xf32>
    %17 = vector.shape_cast %16 : vector<8x1xf32> to vector<8x1xf32>
    %18 = vector.broadcast %17 : vector<8x1xf32> to vector<8x128xf32>
    %c17_i32 = arith.constant 17 : i32
    %19 = tpu.dynamic_rotate %1 by %c17_i32 dim 1 : vector<8x512xf32>, i32 -> vector<8x512xf32>
    %c16_i32 = arith.constant 16 : i32
    %20 = tpu.dynamic_rotate %1 by %c16_i32 dim 1 : vector<8x512xf32>, i32 -> vector<8x512xf32>
    %c15_i32 = arith.constant 15 : i32
    %21 = tpu.dynamic_rotate %1 by %c15_i32 dim 1 : vector<8x512xf32>, i32 -> vector<8x512xf32>
    %c1_i32 = arith.constant 1 : i32
    %22 = tpu.dynamic_rotate %1 by %c1_i32 dim 1 : vector<8x512xf32>, i32 -> vector<8x512xf32>
    %c511_i32 = arith.constant 511 : i32
    %23 = tpu.dynamic_rotate %1 by %c511_i32 dim 1 : vector<8x512xf32>, i32 -> vector<8x512xf32>
    %c497_i32 = arith.constant 497 : i32
    %24 = tpu.dynamic_rotate %1 by %c497_i32 dim 1 : vector<8x512xf32>, i32 -> vector<8x512xf32>
    %c496_i32 = arith.constant 496 : i32
    %25 = tpu.dynamic_rotate %1 by %c496_i32 dim 1 : vector<8x512xf32>, i32 -> vector<8x512xf32>
    %c495_i32 = arith.constant 495 : i32
    %26 = tpu.dynamic_rotate %1 by %c495_i32 dim 1 : vector<8x512xf32>, i32 -> vector<8x512xf32>
    %27 = tpu.concatenate %19, %20, %21, %22, %1, %23, %24, %25, %26 in 0 : vector<8x512xf32>, vector<8x512xf32>, vector<8x512xf32>, vector<8x512xf32>, vector<8x512xf32>, vector<8x512xf32>, vector<8x512xf32>, vector<8x512xf32>, vector<8x512xf32> -> vector<72x512xf32>
    %28 = arith.mulf %27, %5 : vector<72x512xf32>
    %cst = arith.constant dense<0.000000e+00> : vector<8x512xf32>
    %29 = tpu.matmul %2, %28, %cst {dimension_numbers = #tpu.dot_dimension_numbers<[1], [0], [0], [1], [0, 0, 1, 1], [], []>} : vector<8x72xf32>, vector<72x512xf32>, vector<8x512xf32> -> vector<8x512xf32>
    %30 = arith.addf %29, %12 : vector<8x512xf32>
    %c17_i32_18 = arith.constant 17 : i32
    %31 = tpu.dynamic_rotate %30 by %c17_i32_18 dim 1 : vector<8x512xf32>, i32 -> vector<8x512xf32>
    %32 = vector.extract_strided_slice %7 {offsets = [0, 0], sizes = [1, 512], strides = [1, 1]} : vector<9x512xf32> to vector<1x512xf32>
    %33 = vector.broadcast %32 : vector<1x512xf32> to vector<8x512xf32>
    %34 = arith.addf %31, %33 : vector<8x512xf32>
    %c16_i32_19 = arith.constant 16 : i32
    %35 = tpu.dynamic_rotate %30 by %c16_i32_19 dim 1 : vector<8x512xf32>, i32 -> vector<8x512xf32>
    %36 = vector.extract_strided_slice %7 {offsets = [1, 0], sizes = [1, 512], strides = [1, 1]} : vector<9x512xf32> to vector<1x512xf32>
    %37 = vector.broadcast %36 : vector<1x512xf32> to vector<8x512xf32>
    %38 = arith.addf %35, %37 : vector<8x512xf32>
    %39 = arith.maximumf %34, %38 : vector<8x512xf32>
    %c15_i32_20 = arith.constant 15 : i32
    %40 = tpu.dynamic_rotate %30 by %c15_i32_20 dim 1 : vector<8x512xf32>, i32 -> vector<8x512xf32>
    %41 = vector.extract_strided_slice %7 {offsets = [2, 0], sizes = [1, 512], strides = [1, 1]} : vector<9x512xf32> to vector<1x512xf32>
    %42 = vector.broadcast %41 : vector<1x512xf32> to vector<8x512xf32>
    %43 = arith.addf %40, %42 : vector<8x512xf32>
    %44 = arith.maximumf %39, %43 : vector<8x512xf32>
    %c1_i32_21 = arith.constant 1 : i32
    %45 = tpu.dynamic_rotate %30 by %c1_i32_21 dim 1 : vector<8x512xf32>, i32 -> vector<8x512xf32>
    %46 = vector.extract_strided_slice %7 {offsets = [3, 0], sizes = [1, 512], strides = [1, 1]} : vector<9x512xf32> to vector<1x512xf32>
    %47 = vector.broadcast %46 : vector<1x512xf32> to vector<8x512xf32>
    %48 = arith.addf %45, %47 : vector<8x512xf32>
    %49 = arith.maximumf %44, %48 : vector<8x512xf32>
    %50 = vector.extract_strided_slice %7 {offsets = [4, 0], sizes = [1, 512], strides = [1, 1]} : vector<9x512xf32> to vector<1x512xf32>
    %51 = vector.broadcast %50 : vector<1x512xf32> to vector<8x512xf32>
    %52 = arith.addf %30, %51 : vector<8x512xf32>
    %53 = arith.maximumf %49, %52 : vector<8x512xf32>
    %c511_i32_22 = arith.constant 511 : i32
    %54 = tpu.dynamic_rotate %30 by %c511_i32_22 dim 1 : vector<8x512xf32>, i32 -> vector<8x512xf32>
    %55 = vector.extract_strided_slice %7 {offsets = [5, 0], sizes = [1, 512], strides = [1, 1]} : vector<9x512xf32> to vector<1x512xf32>
    %56 = vector.broadcast %55 : vector<1x512xf32> to vector<8x512xf32>
    %57 = arith.addf %54, %56 : vector<8x512xf32>
    %58 = arith.maximumf %53, %57 : vector<8x512xf32>
    %c497_i32_23 = arith.constant 497 : i32
    %59 = tpu.dynamic_rotate %30 by %c497_i32_23 dim 1 : vector<8x512xf32>, i32 -> vector<8x512xf32>
    %60 = vector.extract_strided_slice %7 {offsets = [6, 0], sizes = [1, 512], strides = [1, 1]} : vector<9x512xf32> to vector<1x512xf32>
    %61 = vector.broadcast %60 : vector<1x512xf32> to vector<8x512xf32>
    %62 = arith.addf %59, %61 : vector<8x512xf32>
    %63 = arith.maximumf %58, %62 : vector<8x512xf32>
    %c496_i32_24 = arith.constant 496 : i32
    %64 = tpu.dynamic_rotate %30 by %c496_i32_24 dim 1 : vector<8x512xf32>, i32 -> vector<8x512xf32>
    %65 = vector.extract_strided_slice %7 {offsets = [7, 0], sizes = [1, 512], strides = [1, 1]} : vector<9x512xf32> to vector<1x512xf32>
    %66 = vector.broadcast %65 : vector<1x512xf32> to vector<8x512xf32>
    %67 = arith.addf %64, %66 : vector<8x512xf32>
    %68 = arith.maximumf %63, %67 : vector<8x512xf32>
    %c495_i32_25 = arith.constant 495 : i32
    %69 = tpu.dynamic_rotate %30 by %c495_i32_25 dim 1 : vector<8x512xf32>, i32 -> vector<8x512xf32>
    %70 = vector.extract_strided_slice %7 {offsets = [8, 0], sizes = [1, 512], strides = [1, 1]} : vector<9x512xf32> to vector<1x512xf32>
    %71 = vector.broadcast %70 : vector<1x512xf32> to vector<8x512xf32>
    %72 = arith.addf %69, %71 : vector<8x512xf32>
    %73 = arith.maximumf %68, %72 : vector<8x512xf32>
    %74 = vector.extract_strided_slice %73 {offsets = [0, 0], sizes = [8, 256], strides = [1, 1]} : vector<8x512xf32> to vector<8x256xf32>
    %cst_26 = arith.constant dense<0.000000e+00> : vector<8x64xf32>
    %75 = tpu.matmul %74, %8, %cst_26 {dimension_numbers = #tpu.dot_dimension_numbers<[1], [0], [0], [1], [0, 0, 1, 1], [], []>} : vector<8x256xf32>, vector<256x64xf32>, vector<8x64xf32> -> vector<8x64xf32>
    %76 = vector.extract_strided_slice %73 {offsets = [0, 256], sizes = [8, 256], strides = [1, 1]} : vector<8x512xf32> to vector<8x256xf32>
    %cst_27 = arith.constant dense<0.000000e+00> : vector<8x64xf32>
    %77 = tpu.matmul %76, %8, %cst_27 {dimension_numbers = #tpu.dot_dimension_numbers<[1], [0], [0], [1], [0, 0, 1, 1], [], []>} : vector<8x256xf32>, vector<256x64xf32>, vector<8x64xf32> -> vector<8x64xf32>
    %78 = tpu.concatenate %75, %77 in 1 : vector<8x64xf32>, vector<8x64xf32> -> vector<8x128xf32>
    %cst_28 = arith.constant 0.000000e+00 : f32
    %79 = vector.broadcast %cst_28 : f32 to vector<8x128xf32>
    %80 = arith.maximumf %78, %79 : vector<8x128xf32>
    %c9_i32 = arith.constant 9 : i32
    %81 = tpu.dynamic_rotate %80 by %c9_i32 dim 1 : vector<8x128xf32>, i32 -> vector<8x128xf32>
    %c8_i32 = arith.constant 8 : i32
    %82 = tpu.dynamic_rotate %80 by %c8_i32 dim 1 : vector<8x128xf32>, i32 -> vector<8x128xf32>
    %c7_i32 = arith.constant 7 : i32
    %83 = tpu.dynamic_rotate %80 by %c7_i32 dim 1 : vector<8x128xf32>, i32 -> vector<8x128xf32>
    %c1_i32_29 = arith.constant 1 : i32
    %84 = tpu.dynamic_rotate %80 by %c1_i32_29 dim 1 : vector<8x128xf32>, i32 -> vector<8x128xf32>
    %c127_i32 = arith.constant 127 : i32
    %85 = tpu.dynamic_rotate %80 by %c127_i32 dim 1 : vector<8x128xf32>, i32 -> vector<8x128xf32>
    %c121_i32 = arith.constant 121 : i32
    %86 = tpu.dynamic_rotate %80 by %c121_i32 dim 1 : vector<8x128xf32>, i32 -> vector<8x128xf32>
    %c120_i32 = arith.constant 120 : i32
    %87 = tpu.dynamic_rotate %80 by %c120_i32 dim 1 : vector<8x128xf32>, i32 -> vector<8x128xf32>
    %c119_i32 = arith.constant 119 : i32
    %88 = tpu.dynamic_rotate %80 by %c119_i32 dim 1 : vector<8x128xf32>, i32 -> vector<8x128xf32>
    %89 = tpu.concatenate %81, %82, %83, %84, %80, %85, %86, %87, %88 in 0 : vector<8x128xf32>, vector<8x128xf32>, vector<8x128xf32>, vector<8x128xf32>, vector<8x128xf32>, vector<8x128xf32>, vector<8x128xf32>, vector<8x128xf32>, vector<8x128xf32> -> vector<72x128xf32>
    %90 = arith.mulf %89, %6 : vector<72x128xf32>
    %cst_30 = arith.constant dense<0.000000e+00> : vector<8x128xf32>
    %91 = tpu.matmul %3, %90, %cst_30 {dimension_numbers = #tpu.dot_dimension_numbers<[1], [0], [0], [1], [0, 0, 1, 1], [], []>} : vector<8x72xf32>, vector<72x128xf32>, vector<8x128xf32> -> vector<8x128xf32>
    %92 = arith.addf %91, %15 : vector<8x128xf32>
    %cst_31 = arith.constant 0.000000e+00 : f32
    %93 = vector.broadcast %cst_31 : f32 to vector<8x128xf32>
    %94 = arith.maximumf %92, %93 : vector<8x128xf32>
    %c9_i32_32 = arith.constant 9 : i32
    %95 = tpu.dynamic_rotate %94 by %c9_i32_32 dim 1 : vector<8x128xf32>, i32 -> vector<8x128xf32>
    %c8_i32_33 = arith.constant 8 : i32
    %96 = tpu.dynamic_rotate %94 by %c8_i32_33 dim 1 : vector<8x128xf32>, i32 -> vector<8x128xf32>
    %c7_i32_34 = arith.constant 7 : i32
    %97 = tpu.dynamic_rotate %94 by %c7_i32_34 dim 1 : vector<8x128xf32>, i32 -> vector<8x128xf32>
    %c1_i32_35 = arith.constant 1 : i32
    %98 = tpu.dynamic_rotate %94 by %c1_i32_35 dim 1 : vector<8x128xf32>, i32 -> vector<8x128xf32>
    %c127_i32_36 = arith.constant 127 : i32
    %99 = tpu.dynamic_rotate %94 by %c127_i32_36 dim 1 : vector<8x128xf32>, i32 -> vector<8x128xf32>
    %c121_i32_37 = arith.constant 121 : i32
    %100 = tpu.dynamic_rotate %94 by %c121_i32_37 dim 1 : vector<8x128xf32>, i32 -> vector<8x128xf32>
    %c120_i32_38 = arith.constant 120 : i32
    %101 = tpu.dynamic_rotate %94 by %c120_i32_38 dim 1 : vector<8x128xf32>, i32 -> vector<8x128xf32>
    %c119_i32_39 = arith.constant 119 : i32
    %102 = tpu.dynamic_rotate %94 by %c119_i32_39 dim 1 : vector<8x128xf32>, i32 -> vector<8x128xf32>
    %103 = tpu.concatenate %95, %96, %97, %98, %94, %99, %100, %101, %102 in 0 : vector<8x128xf32>, vector<8x128xf32>, vector<8x128xf32>, vector<8x128xf32>, vector<8x128xf32>, vector<8x128xf32>, vector<8x128xf32>, vector<8x128xf32>, vector<8x128xf32> -> vector<72x128xf32>
    %104 = arith.mulf %103, %6 : vector<72x128xf32>
    %cst_40 = arith.constant dense<0.000000e+00> : vector<8x128xf32>
    %105 = tpu.matmul %4, %104, %cst_40 {dimension_numbers = #tpu.dot_dimension_numbers<[1], [0], [0], [1], [0, 0, 1, 1], [], []>} : vector<8x72xf32>, vector<72x128xf32>, vector<8x128xf32> -> vector<8x128xf32>
    %106 = arith.addf %105, %18 : vector<8x128xf32>
    %107 = arith.addf %78, %106 : vector<8x128xf32>
    %cst_41 = arith.constant 0.000000e+00 : f32
    %108 = vector.broadcast %cst_41 : f32 to vector<8x128xf32>
    %109 = arith.maximumf %107, %108 : vector<8x128xf32>
    %c9_i32_42 = arith.constant 9 : i32
    %110 = tpu.dynamic_rotate %109 by %c9_i32_42 dim 1 : vector<8x128xf32>, i32 -> vector<8x128xf32>
    %c8_i32_43 = arith.constant 8 : i32
    %111 = tpu.dynamic_rotate %109 by %c8_i32_43 dim 1 : vector<8x128xf32>, i32 -> vector<8x128xf32>
    %c7_i32_44 = arith.constant 7 : i32
    %112 = tpu.dynamic_rotate %109 by %c7_i32_44 dim 1 : vector<8x128xf32>, i32 -> vector<8x128xf32>
    %c1_i32_45 = arith.constant 1 : i32
    %113 = tpu.dynamic_rotate %109 by %c1_i32_45 dim 1 : vector<8x128xf32>, i32 -> vector<8x128xf32>
    %c127_i32_46 = arith.constant 127 : i32
    %114 = tpu.dynamic_rotate %109 by %c127_i32_46 dim 1 : vector<8x128xf32>, i32 -> vector<8x128xf32>
    %c121_i32_47 = arith.constant 121 : i32
    %115 = tpu.dynamic_rotate %109 by %c121_i32_47 dim 1 : vector<8x128xf32>, i32 -> vector<8x128xf32>
    %c120_i32_48 = arith.constant 120 : i32
    %116 = tpu.dynamic_rotate %109 by %c120_i32_48 dim 1 : vector<8x128xf32>, i32 -> vector<8x128xf32>
    %c119_i32_49 = arith.constant 119 : i32
    %117 = tpu.dynamic_rotate %109 by %c119_i32_49 dim 1 : vector<8x128xf32>, i32 -> vector<8x128xf32>
    %118 = tpu.concatenate %110, %111, %112, %113, %109, %114, %115, %116, %117 in 0 : vector<8x128xf32>, vector<8x128xf32>, vector<8x128xf32>, vector<8x128xf32>, vector<8x128xf32>, vector<8x128xf32>, vector<8x128xf32>, vector<8x128xf32>, vector<8x128xf32> -> vector<72x128xf32>
    %119 = arith.mulf %118, %6 : vector<72x128xf32>
    %cst_50 = arith.constant dense<0.000000e+00> : vector<8x128xf32>
    %120 = tpu.matmul %3, %119, %cst_50 {dimension_numbers = #tpu.dot_dimension_numbers<[1], [0], [0], [1], [0, 0, 1, 1], [], []>} : vector<8x72xf32>, vector<72x128xf32>, vector<8x128xf32> -> vector<8x128xf32>
    %121 = arith.addf %120, %15 : vector<8x128xf32>
    %cst_51 = arith.constant 0.000000e+00 : f32
    %122 = vector.broadcast %cst_51 : f32 to vector<8x128xf32>
    %123 = arith.maximumf %121, %122 : vector<8x128xf32>
    %c9_i32_52 = arith.constant 9 : i32
    %124 = tpu.dynamic_rotate %123 by %c9_i32_52 dim 1 : vector<8x128xf32>, i32 -> vector<8x128xf32>
    %c8_i32_53 = arith.constant 8 : i32
    %125 = tpu.dynamic_rotate %123 by %c8_i32_53 dim 1 : vector<8x128xf32>, i32 -> vector<8x128xf32>
    %c7_i32_54 = arith.constant 7 : i32
    %126 = tpu.dynamic_rotate %123 by %c7_i32_54 dim 1 : vector<8x128xf32>, i32 -> vector<8x128xf32>
    %c1_i32_55 = arith.constant 1 : i32
    %127 = tpu.dynamic_rotate %123 by %c1_i32_55 dim 1 : vector<8x128xf32>, i32 -> vector<8x128xf32>
    %c127_i32_56 = arith.constant 127 : i32
    %128 = tpu.dynamic_rotate %123 by %c127_i32_56 dim 1 : vector<8x128xf32>, i32 -> vector<8x128xf32>
    %c121_i32_57 = arith.constant 121 : i32
    %129 = tpu.dynamic_rotate %123 by %c121_i32_57 dim 1 : vector<8x128xf32>, i32 -> vector<8x128xf32>
    %c120_i32_58 = arith.constant 120 : i32
    %130 = tpu.dynamic_rotate %123 by %c120_i32_58 dim 1 : vector<8x128xf32>, i32 -> vector<8x128xf32>
    %c119_i32_59 = arith.constant 119 : i32
    %131 = tpu.dynamic_rotate %123 by %c119_i32_59 dim 1 : vector<8x128xf32>, i32 -> vector<8x128xf32>
    %132 = tpu.concatenate %124, %125, %126, %127, %123, %128, %129, %130, %131 in 0 : vector<8x128xf32>, vector<8x128xf32>, vector<8x128xf32>, vector<8x128xf32>, vector<8x128xf32>, vector<8x128xf32>, vector<8x128xf32>, vector<8x128xf32>, vector<8x128xf32> -> vector<72x128xf32>
    %133 = arith.mulf %132, %6 : vector<72x128xf32>
    %cst_60 = arith.constant dense<0.000000e+00> : vector<8x128xf32>
    %134 = tpu.matmul %4, %133, %cst_60 {dimension_numbers = #tpu.dot_dimension_numbers<[1], [0], [0], [1], [0, 0, 1, 1], [], []>} : vector<8x72xf32>, vector<72x128xf32>, vector<8x128xf32> -> vector<8x128xf32>
    %135 = arith.addf %134, %18 : vector<8x128xf32>
    %136 = arith.addf %107, %135 : vector<8x128xf32>
    %c0_61 = arith.constant 0 : index
    %c0_62 = arith.constant 0 : index
    %c0_63 = arith.constant 0 : index
    %137 = vector.load %arg10[%c0_61, %c0_62, %c0_63] : memref<1x8x128xf32, #tpu.memory_space<vmem>>, vector<1x8x128xf32>
    %138 = vector.shape_cast %137 : vector<1x8x128xf32> to vector<8x128xf32>
    %139 = vector.shape_cast %136 : vector<8x128xf32> to vector<1x8x128xf32>
    tpu.vector_store %arg10[%c0_61, %c0_62, %c0_63], %139 {strides = array<i32>} : memref<1x8x128xf32, #tpu.memory_space<vmem>>, vector<1x8x128xf32>,
    return
  }
  func.func @transform_0(%arg0: i32) -> (i32, i32, i32) {
    %c0_i32 = arith.constant 0 : i32
    %c0_i32_0 = arith.constant 0 : i32
    %c0_i32_1 = arith.constant 0 : i32
    return %arg0, %c0_i32, %c0_i32_0 : i32, i32, i32
  }
  func.func @transform_1(%arg0: i32) -> (i32, i32) {
    %c0_i32 = arith.constant 0 : i32
    %c0_i32_0 = arith.constant 0 : i32
    %c0_i32_1 = arith.constant 0 : i32
    return %c0_i32, %c0_i32_0 : i32, i32
  }
  func.func @transform_2(%arg0: i32) -> (i32, i32) {
    %c0_i32 = arith.constant 0 : i32
    %c0_i32_0 = arith.constant 0 : i32
    %c0_i32_1 = arith.constant 0 : i32
    return %c0_i32, %c0_i32_0 : i32, i32
  }
  func.func @transform_3(%arg0: i32) -> (i32, i32) {
    %c0_i32 = arith.constant 0 : i32
    %c0_i32_0 = arith.constant 0 : i32
    %c0_i32_1 = arith.constant 0 : i32
    return %c0_i32, %c0_i32_0 : i32, i32
  }
  func.func @transform_4(%arg0: i32) -> (i32, i32) {
    %c0_i32 = arith.constant 0 : i32
    %c0_i32_0 = arith.constant 0 : i32
    %c0_i32_1 = arith.constant 0 : i32
    return %c0_i32, %c0_i32_0 : i32, i32
  }
  func.func @transform_5(%arg0: i32) -> (i32, i32) {
    %c0_i32 = arith.constant 0 : i32
    %c0_i32_0 = arith.constant 0 : i32
    %c0_i32_1 = arith.constant 0 : i32
    return %c0_i32, %c0_i32_0 : i32, i32
  }
  func.func @transform_6(%arg0: i32) -> (i32, i32) {
    %c0_i32 = arith.constant 0 : i32
    %c0_i32_0 = arith.constant 0 : i32
    %c0_i32_1 = arith.constant 0 : i32
    return %c0_i32, %c0_i32_0 : i32, i32
  }
  func.func @transform_7(%arg0: i32) -> (i32, i32) {
    %c0_i32 = arith.constant 0 : i32
    %c0_i32_0 = arith.constant 0 : i32
    %c0_i32_1 = arith.constant 0 : i32
    return %c0_i32, %c0_i32_0 : i32, i32
  }
  func.func @transform_8(%arg0: i32) -> (i32, i32) {
    %c0_i32 = arith.constant 0 : i32
    %c0_i32_0 = arith.constant 0 : i32
    %c0_i32_1 = arith.constant 0 : i32
    return %c0_i32, %c0_i32_0 : i32, i32
  }
  func.func @transform_9(%arg0: i32) -> (i32, i32, i32) {
    %c0_i32 = arith.constant 0 : i32
    %c0_i32_0 = arith.constant 0 : i32
    %c0_i32_1 = arith.constant 0 : i32
    return %arg0, %c0_i32, %c0_i32_0 : i32, i32, i32
  }
}

</mosaic_0001>

<bundles_post_ra>
// kernel: convnet_block_forward.1
= control target key start
LH: loop header
LB: loop body
LE: loop exit
PB: predicated region body
PF: predicated region fallthrough
CT: control target
= control target key end

     0   :  { %14 = vsyncpa [#allocation3], 0  ;;  %s2510_s0 = inlined_call_operand.vmem [shape: f32[1,8,512], index: 0, kind: input, shape index: {}]   ;;  %s2511_s1 = inlined_call_operand.vmem [shape: f32[8,72], index: 1, kind: input, shape index: {}]   ;;  %s2512_s2 = inlined_call_operand.vmem [shape: f32[8,72], index: 2, kind: input, shape index: {}]   ;;  %s2513_s3 = inlined_call_operand.vmem [shape: f32[8,72], index: 3, kind: input, shape index: {}]   ;;  %s2514_s4 = inlined_call_operand.vmem [shape: f32[8,3], index: 4, kind: input, shape index: {}]   ;;  %s2515_s5 = inlined_call_operand.vmem [shape: f32[72,512], index: 5, kind: input, shape index: {}]   ;;  %s2516_s6 = inlined_call_operand.hbm [shape: f32[72,128], index: 6, kind: input, shape index: {}]   ;;  %s2517_s7 = inlined_call_operand.hbm [shape: f32[9,512], index: 7, kind: input, shape index: {}]   ;;  %s2518_s8 = inlined_call_operand.vmem [shape: f32[256,64], index: 8, kind: input, shape index: {}]   ;;  %s2519_s9 = inlined_call_operand.vmem [shape: f32[1,8,128], index: 9, kind: output, shape index: {}]  }
   0x1   :  { %15 = vsyncpa [#allocation5], 0  ;;  %s1584_s30 = smov [#allocation2]  }
   0x2   :  { %s33_s10 = sshll.u32 %s1584_s30, 4  ;;  %s34_s10 = int_to_ptr.vmem [resolvable:$true] %s33_s10 }
   0x3   :  { %s1548_s11 = scalar_lea.vmem %s34_s10, 1152  ;;  %p1553_p1 = scmp.lt.s32.totalorder %s34_s10, %s34_s10 }
   0x4   :  { %p1549_p0 = scmp.ne.s32.totalorder %s34_s10, %s1548_s11  ;;  %p1554_p2 = scmp.lt.s32.totalorder %s1548_s11, %s1548_s11 }
   0x6   :  { %p1555_p3 = por %p1554_p2, %p1553_p1 }
   0x8   :  { %p1556_p4 = pnand %p1555_p3, %p1549_p0 }
   0xa   :  { %1559 = shalt.err (!%p1556_p4)
}
   0xb   :  { %s1585_s12 = smov 128   ;;  %s1586_s13 = smov 8  }
   0xc   :  { %39 = dma.hbm_to_vmem [thread:$0]  %s2516_s6, 1152, %s34_s10, [#allocation3], %s1585_s12, %s1585_s12, %s1586_s13  }
   0xd   :  { %s1587_s16 = smov [#allocation4]  }
   0xe   :  { %s45_s17 = sshll.u32 %s1587_s16, 4  ;;  %s46_s17 = int_to_ptr.vmem [resolvable:$true] %s45_s17 }
   0xf   :  { %s1568_s18 = scalar_lea.vmem %s46_s17, 1024  ;;  %p1573_p6 = scmp.lt.s32.totalorder %s46_s17, %s46_s17 }
  0x10   :  { %p1569_p5 = scmp.ne.s32.totalorder %s46_s17, %s1568_s18  ;;  %p1574_p7 = scmp.lt.s32.totalorder %s1568_s18, %s1568_s18 }
  0x12   :  { %p1575_p8 = por %p1574_p7, %p1573_p6 }
  0x14   :  { %p1576_p9 = pnand %p1575_p8, %p1569_p5 }
  0x16   :  { %1579 = shalt.err (!%p1576_p9)
}
  0x17   :  { %s1588_s19 = smov 512   ;;  %s1589_s20 = smov 32  }
  0x18   :  { %51 = dma.hbm_to_vmem [thread:$0]  %s2517_s7, 1024, %s46_s17, [#allocation5], %s1588_s19, %s1588_s19, %s1589_s20  }
  0x19   :  { %1580 = dma.done.wait [#allocation3], 1152  }
  0x1a   :  { %1581 = vsyncadd [#allocation3], 4294966144 }
  0x1b   :  { %1582 = dma.done.wait [#allocation5], 1024  }
  0x1c   :  { %1583 = vsyncadd [#allocation5], 4294966272  ;;  %v1669_v0 = vld [vmem:[%s2510_s0 + $0x8] sm:$0xff]  ;;  %v1674_v1 = vld [vmem:[%s2510_s0] sm:$0xff]  ;;  %s1590_s26 = smov 111   ;;  %s1591_s30 = smov 112   ;;  %v174_v7 = vlaneseq }
  0x1d   :  { %261 = vrot.lane.b32.xlu1 %v1669_v0, %s1590_s26  ;;  %259 = vrot.lane.b32.xlu0 %v1674_v1, %s1590_s26  ;;  %v1683_v2 = vld [vmem:[%s2510_s0 + $0x10] sm:$0xff]  ;;  %v1688_v3 = vld [vmem:[%s2510_s0 + $0x18] sm:$0xff]  ;;  %s1592_s0 = smov 113   ;;  %s1593_s10 = smov 127   ;;  %v1597_v4 = vmov 0.0   ;;  %v1598_v5 = vmov 0  }
  0x1e   :  { %s1594_s11 = smov 1   ;;  %s1595_s12 = smov 15   ;;  %447 = vmatprep.mubr.f32.mxu1 %v1597_v4  ;;  %376 = vmatprep.mubr.f32.mxu0 %v1597_v4  ;;  %v152_v6 = vld [vmem:[%s2514_s4] sm:$0xff]  ;;  %v1756_v8 = vand.u32 127, %v174_v7  ;;  %v100_v11 = vld [vmem:[%s2515_s5 + $0x108] sm:$0xff]  ;;  %v102_v12 = vld [vmem:[%s2515_s5 + $0x118] sm:$0xff] }
  0x1f   :  { %s1596_s14 = smov 16   ;;  %1536 = vset.pattern.permute.xlu0 %v1598_v5  ;;  %s1599_s15 = smov 17   ;;  %v101_v13 = vld [vmem:[%s2515_s5 + $0x110] sm:$0xff]  ;;  %v99_v17 = vld [vmem:[%s2515_s5 + $0x100] sm:$0xff]  ;;  %v98_v24 = vld [vmem:[%s2515_s5 + $0xf8] sm:$0xff]  ;;  %vm308_vm8 = vcmask 588800  }
  0x20   :  { %vm267_vm0 = vcmp.lt.s32.totalorder %v1756_v8, 111  ;;  %vm254_vm1 = vcmp.lt.s32.totalorder %v1756_v8, 112  ;;  %v97_v30 = vld [vmem:[%s2515_s5 + $0xf0] sm:$0xff]  ;;  %v95_v31 = vld [vmem:[%s2515_s5 + $0xe0] sm:$0xff]  ;;  %v96_v32 = vld [vmem:[%s2515_s5 + $0xe8] sm:$0xff]  ;;  %vm241_vm2 = vcmp.lt.s32.totalorder %v1756_v8, 113 }
  0x21   :  { %263 = vrot.lane.b32.xlu1 %v1683_v2, %s1590_s26  ;;  %265 = vrot.lane.b32.xlu0 %v1688_v3, %s1590_s26  ;;  %v94_v41 = vld [vmem:[%s2515_s5 + $0xd8] sm:$0xff]  ;;  %v93_v46 = vld [vmem:[%s2515_s5 + $0xd0] sm:$0xff]  ;;  %vm228_vm3 = vcmp.lt.s32.totalorder %v1756_v8, 127  ;;  %vm215_vm4 = vcmp.lt.s32.totalorder %v1756_v8, 1  ;;  %vm202_vm5 = vcmp.lt.s32.totalorder %v1756_v8, 15  ;;  %vm189_vm6 = vcmp.lt.s32.totalorder %v1756_v8, 16 }
  0x22   :  { %v91_v47 = vld [vmem:[%s2515_s5 + $0xc0] sm:$0xff]  ;;  %v92_v48 = vld [vmem:[%s2515_s5 + $0xc8] sm:$0xff]  ;;  %v90_v57 = vld [vmem:[%s2515_s5 + $0xb8] sm:$0xff]  ;;  %vm176_vm7 = vcmp.lt.s32.totalorder %v1756_v8, 17  ;;  %vm906_vm9 = vcmask 523264   ;;  %vm1604_vm10 = vmmov 0  }
  0x23   :  { %v86_v61 = vld [vmem:[%s2515_s5 + $0x98] sm:$0xff]  ;;  %v89_v63 = vld [vmem:[%s2515_s5 + $0xb0] sm:$0xff] }
  0x24   :  { %v85_v5 = vld [vmem:[%s2515_s5 + $0x90] sm:$0xff] }
  0x25   :  { %252 = vrot.lane.b32.xlu1 %v1688_v3, %s1591_s30  ;;  %246 = vrot.lane.b32.xlu0 %v1674_v1, %s1591_s30 }
  0x29   :  { %250 = vrot.lane.b32.xlu1 %v1683_v2, %s1591_s30  ;;  %248 = vrot.lane.b32.xlu0 %v1669_v0, %s1591_s30 }
  0x2d   :  { %239 = vrot.lane.b32.xlu1 %v1688_v3, %s1592_s0  ;;  %233 = vrot.lane.b32.xlu0 %v1674_v1, %s1592_s0 }
  0x31   :  { %237 = vrot.lane.b32.xlu1 %v1683_v2, %s1592_s0  ;;  %235 = vrot.lane.b32.xlu0 %v1669_v0, %s1592_s0 }
  0x35   :  { %226 = vrot.lane.b32.xlu1 %v1688_v3, %s1593_s10  ;;  %220 = vrot.lane.b32.xlu0 %v1674_v1, %s1593_s10 }
  0x39   :  { %224 = vrot.lane.b32.xlu1 %v1683_v2, %s1593_s10  ;;  %222 = vrot.lane.b32.xlu0 %v1669_v0, %s1593_s10 }
  0x3d   :  { %213 = vrot.lane.b32.xlu1 %v1688_v3, %s1594_s11  ;;  %211 = vrot.lane.b32.xlu0 %v1683_v2, %s1594_s11 }
  0x41   :  { %209 = vrot.lane.b32.xlu1 %v1669_v0, %s1594_s11  ;;  %207 = vrot.lane.b32.xlu0 %v1674_v1, %s1594_s11 }
  0x45   :  { %200 = vrot.lane.b32.xlu1 %v1688_v3, %s1595_s12  ;;  %198 = vrot.lane.b32.xlu0 %v1683_v2, %s1595_s12 }
  0x49   :  { %196 = vrot.lane.b32.xlu1 %v1669_v0, %s1595_s12  ;;  %194 = vrot.lane.b32.xlu0 %v1674_v1, %s1595_s12 }
  0x4d   :  { %187 = vrot.lane.b32.xlu1 %v1688_v3, %s1596_s14  ;;  %185 = vrot.lane.b32.xlu0 %v1683_v2, %s1596_s14 }
  0x51   :  { %183 = vrot.lane.b32.xlu1 %v1669_v0, %s1596_s14  ;;  %181 = vrot.lane.b32.xlu0 %v1674_v1, %s1596_s14 }
  0x55   :  { %172 = vrot.lane.b32.xlu1 %v1688_v3, %s1599_s15  ;;  %170 = vrot.lane.b32.xlu0 %v1683_v2, %s1599_s15 }
  0x59   :  { %168 = vrot.lane.b32.xlu1 %v1669_v0, %s1599_s15  ;;  %166 = vrot.lane.b32.xlu0 %v1674_v1, %s1599_s15 }
  0x5d   :  { %155 = vperm.xlu0 %1536, %v152_v6   ;;  %v87_v6 = vld [vmem:[%s2515_s5 + $0xa0] sm:$0xff] }
  0x8f   :  { %v262_v9 = vpop.permute.xlu1 %261  ;;  %v260_v10 = vpop.permute.xlu0 %259 }
  0x90   :  { %v270_v14 = vsel %vm267_vm0, %v260_v10, %v262_v9 }
  0x91   :  { %v304_v25 = vmul.f32 %v270_v14, %v99_v17  ;;  %v83_v14 = vld [vmem:[%s2515_s5 + $0x80] sm:$0xff] }
  0x93   :  { %v264_v15 = vpop.permute.xlu1 %263  ;;  %v266_v16 = vpop.permute.xlu0 %265 }
  0x94   :  { %v268_v18 = vsel %vm267_vm0, %v264_v15, %v266_v16  ;;  %v269_v19 = vsel %vm267_vm0, %v262_v9, %v264_v15  ;;  %v271_v20 = vsel %vm267_vm0, %v266_v16, %v260_v10  ;;  %v88_v9 = vld [vmem:[%s2515_s5 + $0xa8] sm:$0xff] }
  0x95   :  { %v305_v21 = vmul.f32 %v269_v19, %v100_v11  ;;  %v307_v22 = vmul.f32 %v271_v20, %v102_v12  ;;  %v306_v23 = vmul.f32 %v268_v18, %v101_v13  ;;  %v84_v10 = vld [vmem:[%s2515_s5 + $0x88] sm:$0xff]  ;;  %v291_v13 = vmul.f32 %v86_v61, %v1688_v3 }
  0x96   :  { %v290_v18 = vmul.f32 %v85_v5, %v1683_v2  ;;  %v289_v3 = vmul.f32 %v84_v10, %v1669_v0  ;;  %v81_v0 = vld [vmem:[%s2515_s5 + $0x70] sm:$0xff] }
  0x97   :  { %326 = vmatprep.subr.mxu0 %v305_v21  ;;  %v253_v26 = vpop.permute.xlu1 %252  ;;  %397 = vmatprep.subr.mxu1 %v307_v22  ;;  %v247_v27 = vpop.permute.xlu0 %246  ;;  %v82_v22 = vld [vmem:[%s2515_s5 + $0x78] sm:$0xff] }
  0x98   :  { %v258_v28 = vsel %vm254_vm1, %v253_v26, %v247_v27  ;;  %327 = vmatpush1.msra.mxu0 %v304_v25  ;;  %398 = vmatpush1.msra.mxu1 %v306_v23  ;;  %v288_v23 = vmul.f32 %v83_v14, %v1674_v1  ;;  %v79_v1 = vld [vmem:[%s2515_s5 + $0x60] sm:$0xff] }
  0x99   :  { %v303_v29 = vmul.f32 %v258_v28, %v98_v24 }
  0x9b   :  { %v251_v33 = vpop.permute.xlu1 %250  ;;  %399 = vmatprep.subr.mxu1 %v303_v29  ;;  %v249_v34 = vpop.permute.xlu0 %248 }
  0x9c   :  { %v255_v35 = vsel %vm254_vm1, %v251_v33, %v253_v26  ;;  %v256_v36 = vsel %vm254_vm1, %v249_v34, %v251_v33  ;;  %v257_v37 = vsel %vm254_vm1, %v247_v27, %v249_v34  ;;  %v80_v27 = vld [vmem:[%s2515_s5 + $0x68] sm:$0xff] }
  0x9d   :  { %v302_v38 = vmul.f32 %v255_v35, %v97_v30  ;;  %v300_v39 = vmul.f32 %v257_v37, %v95_v31  ;;  %v301_v40 = vmul.f32 %v256_v36, %v96_v32  ;;  %v78_v36 = vld [vmem:[%s2515_s5 + $0x58] sm:$0xff] }
  0x9f   :  { %v240_v42 = vpop.permute.xlu1 %239  ;;  %328 = vmatprep.subr.mxu0 %v301_v40  ;;  %400 = vmatpush1.msra.mxu1 %v302_v38  ;;  %v234_v43 = vpop.permute.xlu0 %233 }
  0xa0   :  { %v245_v44 = vsel %vm241_vm2, %v240_v42, %v234_v43  ;;  %329 = vmatpush1.msra.mxu0 %v300_v39 }
  0xa1   :  { %v299_v45 = vmul.f32 %v245_v44, %v94_v41  ;;  %v77_v41 = vld [vmem:[%s2515_s5 + $0x50] sm:$0xff] }
  0xa3   :  { %v238_v49 = vpop.permute.xlu1 %237  ;;  %401 = vmatprep.subr.mxu1 %v299_v45  ;;  %v236_v50 = vpop.permute.xlu0 %235 }
  0xa4   :  { %v242_v51 = vsel %vm241_vm2, %v238_v49, %v240_v42  ;;  %v243_v52 = vsel %vm241_vm2, %v236_v50, %v238_v49  ;;  %v244_v53 = vsel %vm241_vm2, %v234_v43, %v236_v50  ;;  %v75_v42 = vld [vmem:[%s2515_s5 + $0x40] sm:$0xff]  ;;  %v76_v43 = vld [vmem:[%s2515_s5 + $0x48] sm:$0xff] }
  0xa5   :  { %v298_v54 = vmul.f32 %v242_v51, %v93_v46  ;;  %v296_v55 = vmul.f32 %v244_v53, %v91_v47  ;;  %v297_v56 = vmul.f32 %v243_v52, %v92_v48  ;;  %v74_v52 = vld [vmem:[%s2515_s5 + $0x38] sm:$0xff] }
  0xa7   :  { %v227_v58 = vpop.permute.xlu1 %226  ;;  %330 = vmatprep.subr.mxu0 %v297_v56  ;;  %402 = vmatpush1.msra.mxu1 %v298_v54  ;;  %v221_v59 = vpop.permute.xlu0 %220 }
  0xa8   :  { %v232_v60 = vsel %vm228_vm3, %v227_v58, %v221_v59  ;;  %331 = vmatpush1.msra.mxu0 %v296_v55 }
  0xa9   :  { %v295_v62 = vmul.f32 %v232_v60, %v90_v57  ;;  %v73_v57 = vld [vmem:[%s2515_s5 + $0x30] sm:$0xff] }
  0xab   :  { %v225_v11 = vpop.permute.xlu1 %224  ;;  %403 = vmatprep.subr.mxu1 %v295_v62  ;;  %v223_v12 = vpop.permute.xlu0 %222 }
  0xac   :  { %v229_v15 = vsel %vm228_vm3, %v225_v11, %v227_v58  ;;  %v230_v16 = vsel %vm228_vm3, %v223_v12, %v225_v11  ;;  %v231_v17 = vsel %vm228_vm3, %v221_v59, %v223_v12  ;;  %v71_v58 = vld [vmem:[%s2515_s5 + $0x20] sm:$0xff]  ;;  %v72_v59 = vld [vmem:[%s2515_s5 + $0x28] sm:$0xff]  ;;  %v70_v11 = vld [vmem:[%s2515_s5 + $0x18] sm:$0xff] }
  0xad   :  { %v294_v19 = vmul.f32 %v229_v15, %v89_v63  ;;  %v292_v20 = vmul.f32 %v231_v17, %v87_v6  ;;  %v293_v21 = vmul.f32 %v230_v16, %v88_v9  ;;  %v69_v16 = vld [vmem:[%s2515_s5 + $0x10] sm:$0xff]  ;;  %v67_v17 = vld [vmem:[%s2515_s5] sm:$0xff] }
  0xaf   :  { %v214_v24 = vpop.permute.xlu1 %213  ;;  %332 = vmatprep.subr.mxu0 %v293_v21  ;;  %404 = vmatpush1.msra.mxu1 %v294_v19  ;;  %v212_v25 = vpop.permute.xlu0 %211 }
  0xb0   :  { %v216_v26 = vsel %vm215_vm4, %v212_v25, %v214_v24  ;;  %333 = vmatpush1.msra.mxu0 %v292_v20  ;;  %405 = vmatprep.subr.mxu1 %v291_v13 }
  0xb1   :  { %v287_v2 = vmul.f32 %v216_v26, %v82_v22  ;;  %406 = vmatpush1.msra.mxu1 %v290_v18  ;;  %334 = vmatprep.subr.mxu0 %v289_v3  ;;  %v68_v18 = vld [vmem:[%s2515_s5 + $0x8] sm:$0xff]  ;;  %v64_v26 = vld [vmem:[%s2511_s1] sm:$0xff] }
  0xb2   :  { %335 = vmatpush1.msra.mxu0 %v288_v23 }
  0xb3   :  { %v210_v28 = vpop.permute.xlu1 %209  ;;  %407 = vmatprep.subr.mxu1 %v287_v2  ;;  %v208_v29 = vpop.permute.xlu0 %207 }
  0xb4   :  { %v217_v30 = vsel %vm215_vm4, %v210_v28, %v212_v25  ;;  %v218_v31 = vsel %vm215_vm4, %v208_v29, %v210_v28  ;;  %v219_v32 = vsel %vm215_vm4, %v214_v24, %v208_v29  ;;  %v151_v29 = vld [vmem:[%s2518_s8 + $0xf8] sm:$0xff] }
  0xb5   :  { %v286_v33 = vmul.f32 %v217_v30, %v81_v0  ;;  %v284_v34 = vmul.f32 %v219_v32, %v79_v1  ;;  %v285_v35 = vmul.f32 %v218_v31, %v80_v27  ;;  %v135_v30 = vld [vmem:[%s2518_s8 + $0x78] sm:$0xff]  ;;  %v150_v31 = vld [vmem:[%s2518_s8 + $0xf0] sm:$0xff] }
  0xb6   :  { %v134_v32 = vld [vmem:[%s2518_s8 + $0x70] sm:$0xff] }
  0xb7   :  { %v201_v37 = vpop.permute.xlu1 %200  ;;  %408 = vmatpush1.msra.mxu1 %v286_v33  ;;  %v199_v38 = vpop.permute.xlu0 %198  ;;  %336 = vmatprep.subr.mxu0 %v285_v35  ;;  %v133_v35 = vld [vmem:[%s2518_s8 + $0x68] sm:$0xff] }
  0xb8   :  { %v203_v39 = vsel %vm202_vm5, %v199_v38, %v201_v37  ;;  %337 = vmatpush1.msra.mxu0 %v284_v34  ;;  %v149_v34 = vld [vmem:[%s2518_s8 + $0xe8] sm:$0xff] }
  0xb9   :  { %v283_v40 = vmul.f32 %v203_v39, %v78_v36  ;;  %v132_v39 = vld [vmem:[%s2518_s8 + $0x60] sm:$0xff] }
  0xbb   :  { %v197_v44 = vpop.permute.xlu1 %196  ;;  %409 = vmatprep.subr.mxu1 %v283_v40  ;;  %v195_v45 = vpop.permute.xlu0 %194  ;;  %v147_v40 = vld [vmem:[%s2518_s8 + $0xd8] sm:$0xff] }
  0xbc   :  { %v204_v46 = vsel %vm202_vm5, %v197_v44, %v199_v38  ;;  %v205_v47 = vsel %vm202_vm5, %v195_v45, %v197_v44  ;;  %v206_v48 = vsel %vm202_vm5, %v201_v37, %v195_v45  ;;  %v148_v37 = vld [vmem:[%s2518_s8 + $0xe0] sm:$0xff]  ;;  %v130_v44 = vld [vmem:[%s2518_s8 + $0x50] sm:$0xff]  ;;  %v145_v45 = vld [vmem:[%s2518_s8 + $0xc8] sm:$0xff] }
  0xbd   :  { %v282_v49 = vmul.f32 %v204_v46, %v77_v41  ;;  %v280_v50 = vmul.f32 %v206_v48, %v75_v42  ;;  %v281_v51 = vmul.f32 %v205_v47, %v76_v43  ;;  %v131_v42 = vld [vmem:[%s2518_s8 + $0x58] sm:$0xff]  ;;  %v146_v43 = vld [vmem:[%s2518_s8 + $0xd0] sm:$0xff]  ;;  %v129_v46 = vld [vmem:[%s2518_s8 + $0x48] sm:$0xff] }
  0xbe   :  { %v144_v47 = vld [vmem:[%s2518_s8 + $0xc0] sm:$0xff] }
  0xbf   :  { %v188_v53 = vpop.permute.xlu1 %187  ;;  %410 = vmatpush1.msra.mxu1 %v282_v49  ;;  %v186_v54 = vpop.permute.xlu0 %185  ;;  %338 = vmatprep.subr.mxu0 %v281_v51  ;;  %v128_v48 = vld [vmem:[%s2518_s8 + $0x40] sm:$0xff]  ;;  %v143_v49 = vld [vmem:[%s2518_s8 + $0xb8] sm:$0xff]  ;;  %v142_v51 = vld [vmem:[%s2518_s8 + $0xb0] sm:$0xff] }
  0xc0   :  { %v190_v55 = vsel %vm189_vm6, %v186_v54, %v188_v53  ;;  %339 = vmatpush1.msra.mxu0 %v280_v50  ;;  %v127_v50 = vld [vmem:[%s2518_s8 + $0x38] sm:$0xff] }
  0xc1   :  { %v279_v56 = vmul.f32 %v190_v55, %v74_v52  ;;  %v126_v52 = vld [vmem:[%s2518_s8 + $0x30] sm:$0xff]  ;;  %v140_v55 = vld [vmem:[%s2518_s8 + $0xa0] sm:$0xff] }
  0xc3   :  { %v184_v60 = vpop.permute.xlu1 %183  ;;  %411 = vmatprep.subr.mxu1 %v279_v56  ;;  %v182_v61 = vpop.permute.xlu0 %181  ;;  %v124_v56 = vld [vmem:[%s2518_s8 + $0x20] sm:$0xff] }
  0xc4   :  { %v191_v62 = vsel %vm189_vm6, %v184_v60, %v186_v54  ;;  %v192_v63 = vsel %vm189_vm6, %v182_v61, %v184_v60  ;;  %v193_v5 = vsel %vm189_vm6, %v188_v53, %v182_v61  ;;  %v141_v53 = vld [vmem:[%s2518_s8 + $0xa8] sm:$0xff]  ;;  %v122_v60 = vld [vmem:[%s2518_s8 + $0x10] sm:$0xff] }
  0xc5   :  { %v278_v6 = vmul.f32 %v191_v62, %v73_v57  ;;  %v276_v9 = vmul.f32 %v193_v5, %v71_v58  ;;  %v277_v10 = vmul.f32 %v192_v63, %v72_v59  ;;  %v125_v54 = vld [vmem:[%s2518_s8 + $0x28] sm:$0xff]  ;;  %v139_v57 = vld [vmem:[%s2518_s8 + $0x98] sm:$0xff]  ;;  %v138_v59 = vld [vmem:[%s2518_s8 + $0x90] sm:$0xff] }
  0xc6   :  { %v123_v58 = vld [vmem:[%s2518_s8 + $0x18] sm:$0xff]  ;;  %v137_v61 = vld [vmem:[%s2518_s8 + $0x88] sm:$0xff]  ;;  %v136_v63 = vld [vmem:[%s2518_s8 + $0x80] sm:$0xff] }
  0xc7   :  { %v173_v12 = vpop.permute.xlu1 %172  ;;  %412 = vmatpush1.msra.mxu1 %v278_v6  ;;  %v171_v13 = vpop.permute.xlu0 %170  ;;  %340 = vmatprep.subr.mxu0 %v277_v10  ;;  %v121_v62 = vld [vmem:[%s2518_s8 + $0x8] sm:$0xff]  ;;  %v120_v5 = vld [vmem:[%s2518_s8] sm:$0xff]  ;;  %s1600_s8 = smov 64  }
  0xc8   :  { %v177_v14 = vsel %vm176_vm7, %v171_v13, %v173_v12  ;;  %341 = vmatpush1.msra.mxu0 %v276_v9 }
  0xc9   :  { %v275_v15 = vmul.f32 %v177_v14, %v70_v11 }
  0xcb   :  { %v169_v19 = vpop.permute.xlu1 %168  ;;  %413 = vmatprep.subr.mxu1 %v275_v15  ;;  %v167_v20 = vpop.permute.xlu0 %166 }
  0xcc   :  { %v178_v21 = vsel %vm176_vm7, %v169_v19, %v171_v13  ;;  %v179_v3 = vsel %vm176_vm7, %v167_v20, %v169_v19  ;;  %v180_v22 = vsel %vm176_vm7, %v173_v12, %v167_v20 }
  0xcd   :  { %v274_v23 = vmul.f32 %v178_v21, %v69_v16  ;;  %v272_v24 = vmul.f32 %v180_v22, %v67_v17  ;;  %v273_v25 = vmul.f32 %v179_v3, %v68_v18  ;;  %v467_v18 = vshrl.u32 %v174_v7, 7  ;;  %v2138_v22 = vld [vmem:[#allocation4 + $0x18] sm:$0xff] }
  0xcf   :  { %342 = vmatprep.subr.mxu0 %v273_v25  ;;  %414 = vmatpush1.msra.mxu1 %v274_v23  ;;  %v2130_v19 = vsub.s32 1, %v467_v18  ;;  %v2136_v3 = vsub.s32 0, %v467_v18  ;;  %v2144_v25 = vsub.s32 2, %v467_v18 }
  0xd0   :  { %343 = vmatpush1.msra.mxu0 %v272_v24  ;;  %1308 = vmatmul.mubr.msk.f32.vlgmr.msra.gmra.mxu1 %vm308_vm8, %v64_v26 }
  0xd1   :  { %1307 = vmatmul.mubr.msk.f32.vlgmr.msra.gmra.mxu0 %vm308_vm8, %v64_v26  ;;  %1352 = vmatprep.subr.mxu1 %v151_v29  ;;  %v513_v23 = vrot.slane %v2138_v22, %v2130_v19 }
  0xd2   :  { %1317 = vmatprep.subr.mxu0 %v151_v29  ;;  %1353 = vmatpush3.msra.mxu1 %v135_v30  ;;  %v549_v29 = vrot.slane %v2138_v22, %v2144_v25 }
  0xd3   :  { %1318 = vmatpush3.msra.mxu0 %v135_v30  ;;  %1354 = vmatprep.subr.mxu1 %v150_v31 }
  0xd4   :  { %1319 = vmatprep.subr.mxu0 %v150_v31  ;;  %1355 = vmatpush3.msra.mxu1 %v134_v32 }
  0xd5   :  { %1320 = vmatpush3.msra.mxu0 %v134_v32  ;;  %1356 = vmatprep.subr.mxu1 %v149_v34 }
  0xd6   :  { %1321 = vmatprep.subr.mxu0 %v149_v34  ;;  %1357 = vmatpush3.msra.mxu1 %v133_v35 }
  0xd7   :  { %1322 = vmatpush3.msra.mxu0 %v133_v35  ;;  %1358 = vmatprep.subr.mxu1 %v148_v37  ;;  %v2169_v35 = vsub.s32 3, %v467_v18 }
  0xd8   :  { %v156_v2 = vpop.permute.xlu0 %155  ;;  %1323 = vmatprep.subr.mxu0 %v148_v37  ;;  %1359 = vmatpush3.msra.mxu1 %v132_v39 }
  0xd9   :  { %1324 = vmatpush3.msra.mxu0 %v132_v39  ;;  %1360 = vmatprep.subr.mxu1 %v147_v40 }
  0xda   :  { %1325 = vmatprep.subr.mxu0 %v147_v40  ;;  %1361 = vmatpush3.msra.mxu1 %v131_v42 }
  0xdb   :  { %1326 = vmatpush3.msra.mxu0 %v131_v42  ;;  %1362 = vmatprep.subr.mxu1 %v146_v43 }
  0xdc   :  { %1327 = vmatprep.subr.mxu0 %v146_v43  ;;  %1363 = vmatpush3.msra.mxu1 %v130_v44 }
  0xdd   :  { %1328 = vmatpush3.msra.mxu0 %v130_v44  ;;  %1364 = vmatprep.subr.mxu1 %v145_v45  ;;  %v2179_v44 = vsub.s32 4, %v467_v18 }
  0xde   :  { %1329 = vmatprep.subr.mxu0 %v145_v45  ;;  %1365 = vmatpush3.msra.mxu1 %v129_v46 }
  0xdf   :  { %1330 = vmatpush3.msra.mxu0 %v129_v46  ;;  %1366 = vmatprep.subr.mxu1 %v144_v47 }
  0xe0   :  { %1331 = vmatprep.subr.mxu0 %v144_v47  ;;  %1367 = vmatpush3.msra.mxu1 %v128_v48 }
  0xe1   :  { %1332 = vmatpush3.msra.mxu0 %v128_v48  ;;  %1368 = vmatprep.subr.mxu1 %v143_v49  ;;  %v585_v48 = vrot.slane %v2138_v22, %v2169_v35 }
  0xe2   :  { %1369 = vmatpush3.msra.mxu1 %v127_v50  ;;  %1333 = vmatprep.subr.mxu0 %v143_v49 }
  0xe3   :  { %1370 = vmatprep.subr.mxu1 %v142_v51  ;;  %1334 = vmatpush3.msra.mxu0 %v127_v50 }
  0xe4   :  { %1371 = vmatpush3.msra.mxu1 %v126_v52  ;;  %1335 = vmatprep.subr.mxu0 %v142_v51 }
  0xe5   :  { %1372 = vmatprep.subr.mxu1 %v141_v53  ;;  %1336 = vmatpush3.msra.mxu0 %v126_v52 }
  0xe6   :  { %1373 = vmatpush3.msra.mxu1 %v125_v54  ;;  %1337 = vmatprep.subr.mxu0 %v141_v53  ;;  %v2195_v53 = vsub.s32 5, %v467_v18 }
  0xe7   :  { %1374 = vmatprep.subr.mxu1 %v140_v55  ;;  %1338 = vmatpush3.msra.mxu0 %v125_v54 }
  0xe8   :  { %1375 = vmatpush3.msra.mxu1 %v124_v56  ;;  %1339 = vmatprep.subr.mxu0 %v140_v55 }
  0xe9   :  { %1376 = vmatprep.subr.mxu1 %v139_v57  ;;  %1340 = vmatpush3.msra.mxu0 %v124_v56 }
  0xea   :  { %1377 = vmatpush3.msra.mxu1 %v123_v58  ;;  %1341 = vmatprep.subr.mxu0 %v139_v57  ;;  %v2199_v57 = vsub.s32 6, %v467_v18 }
  0xeb   :  { %1378 = vmatprep.subr.mxu1 %v138_v59  ;;  %1342 = vmatpush3.msra.mxu0 %v123_v58 }
  0xec   :  { %1379 = vmatpush3.msra.mxu1 %v122_v60  ;;  %1343 = vmatprep.subr.mxu0 %v138_v59  ;;  %v609_v59 = vrot.slane %v2138_v22, %v2179_v44 }
  0xed   :  { %1380 = vmatprep.subr.mxu1 %v137_v61  ;;  %1344 = vmatpush3.msra.mxu0 %v122_v60 }
  0xee   :  { %1381 = vmatpush3.msra.mxu1 %v121_v62  ;;  %1345 = vmatprep.subr.mxu0 %v137_v61 }
  0xef   :  { %1382 = vmatprep.subr.mxu1 %v136_v63  ;;  %1346 = vmatpush3.msra.mxu0 %v121_v62 }
  0xf0   :  { %1383 = vmatpush3.msra.mxu1 %v120_v5  ;;  %1347 = vmatprep.subr.mxu0 %v136_v63 }
  0xf1   :  { %1348 = vmatpush3.msra.mxu0 %v120_v5  ;;  %1448 = vmatprep.subr.mxu1 %v1597_v4  ;;  %v2207_v5 = vsub.s32 7, %v467_v18 }
  0xf2   :  { %1427 = vmatprep.subr.mxu0 %v1597_v4 }
 0x190   :  { %v449_v0 = vpop.f32.mrf.mxu1 }
 0x191   :  { %v1947_v1 = vadd.f32 %v449_v0, %v156_v2  ;;  %v378_v27 = vpop.f32.mrf.mxu0  ;;  %v481_v0 = vrot.slane %v2138_v22, %v2136_v3 }
 0x192   :  { %v1957_v28 = vadd.f32 %v378_v27, %v156_v2  ;;  %v451_v33 = vpop.f32.mrf.mxu1 }
 0x193   :  { %490 = vrot.lane.b32.xlu0 %v1947_v1, %s1596_s14  ;;  %458 = vrot.lane.b32.xlu1 %v1947_v1, %s1599_s15  ;;  %v1985_v36 = vadd.f32 %v451_v33, %v156_v2  ;;  %v380_v38 = vpop.f32.mrf.mxu0 }
 0x194   :  { %v2000_v41 = vadd.f32 %v380_v38, %v156_v2  ;;  %v2151_v2 = vld [vmem:[#allocation4 + $0x10] sm:$0xff] }
 0x195   :  { %v509_v27 = vrot.slane %v2151_v2, %v2130_v19  ;;  %v477_v33 = vrot.slane %v2151_v2, %v2136_v3  ;;  %v545_v47 = vrot.slane %v2151_v2, %v2144_v25  ;;  %v581_v56 = vrot.slane %v2151_v2, %v2169_v35 }
 0x196   :  { %v605_v58 = vrot.slane %v2151_v2, %v2179_v44  ;;  %v613_v18 = vadd.f32 %v609_v59, %v1985_v36 }
 0x197   :  { %526 = vrot.lane.b32.xlu0 %v1947_v1, %s1595_s12  ;;  %562 = vrot.lane.b32.xlu1 %v1947_v1, %s1594_s11 }
 0x19b   :  { %654 = vrot.lane.b32.xlu1 %v1957_v28, %s1592_s0  ;;  %618 = vrot.lane.b32.xlu0 %v1957_v28, %s1593_s10 }
 0x19f   :  { %658 = vrot.lane.b32.xlu1 %v1947_v1, %s1592_s0  ;;  %622 = vrot.lane.b32.xlu0 %v1947_v1, %s1593_s10 }
 0x1a3   :  { %460 = vrot.lane.b32.xlu1 %v1985_v36, %s1599_s15  ;;  %690 = vrot.lane.b32.xlu0 %v1957_v28, %s1591_s30 }
 0x1a7   :  { %492 = vrot.lane.b32.xlu1 %v1985_v36, %s1596_s14  ;;  %456 = vrot.lane.b32.xlu0 %v2000_v41, %s1599_s15 }
 0x1ab   :  { %488 = vrot.lane.b32.xlu1 %v2000_v41, %s1596_s14  ;;  %524 = vrot.lane.b32.xlu0 %v2000_v41, %s1595_s12 }
 0x1af   :  { %528 = vrot.lane.b32.xlu1 %v1985_v36, %s1595_s12  ;;  %564 = vrot.lane.b32.xlu0 %v1985_v36, %s1594_s11 }
 0x1b3   :  { %726 = vrot.lane.b32.xlu1 %v1957_v28, %s1590_s26  ;;  %694 = vrot.lane.b32.xlu0 %v1947_v1, %s1591_s30 }
 0x1b7   :  { %560 = vrot.lane.b32.xlu1 %v2000_v41, %s1594_s11  ;;  %660 = vrot.lane.b32.xlu0 %v1985_v36, %s1592_s0 }
 0x1bb   :  { %624 = vrot.lane.b32.xlu1 %v1985_v36, %s1593_s10  ;;  %732 = vrot.lane.b32.xlu0 %v1985_v36, %s1590_s26 }
 0x1bf   :  { %696 = vrot.lane.b32.xlu1 %v1985_v36, %s1591_s30  ;;  %454 = vrot.lane.b32.xlu0 %v1957_v28, %s1599_s15 }
 0x1c3   :  { %730 = vrot.lane.b32.xlu1 %v1947_v1, %s1590_s26  ;;  %522 = vrot.lane.b32.xlu0 %v1957_v28, %s1595_s12  ;;  %s1606_s12 = smov 7  }
 0x1c7   :  { %486 = vrot.lane.b32.xlu1 %v1957_v28, %s1596_s14  ;;  %620 = vrot.lane.b32.xlu0 %v2000_v41, %s1593_s10  ;;  %s1607_s14 = smov 9  }
 0x1cb   :  { %558 = vrot.lane.b32.xlu1 %v1957_v28, %s1594_s11  ;;  %692 = vrot.lane.b32.xlu0 %v2000_v41, %s1591_s30  ;;  %s1602_s30 = smov 119  }
 0x1cf   :  { %656 = vrot.lane.b32.xlu1 %v2000_v41, %s1592_s0  ;;  %s1603_s0 = smov 121  }
 0x1d3   :  { %728 = vrot.lane.b32.xlu1 %v2000_v41, %s1590_s26  ;;  %s1601_s26 = smov 120  }
 0x205   :  { %v491_v6 = vpop.permute.xlu0 %490  ;;  %v459_v9 = vpop.permute.xlu1 %458 }
 0x209   :  { %v527_v10 = vpop.permute.xlu0 %526  ;;  %v563_v11 = vpop.permute.xlu1 %562 }
 0x20d   :  { %v2117_v12 = vpop.permute.xlu1 %654  ;;  %v2119_v13 = vpop.permute.xlu0 %618 }
 0x211   :  { %v2121_v14 = vpop.permute.xlu1 %658  ;;  %v2123_v15 = vpop.permute.xlu0 %622 }
 0x215   :  { %v2125_v16 = vpop.permute.xlu1 %460  ;;  %v2127_v17 = vpop.permute.xlu0 %690 }
 0x216   :  { %v462_v30 = vsel %vm176_vm7, %v459_v9, %v2125_v16 }
 0x217   :  { %v485_v40 = vadd.f32 %v481_v0, %v462_v30  ;;  %v645_v0 = vrot.slane %v2138_v22, %v2195_v53 }
 0x219   :  { %v2132_v20 = vpop.permute.xlu1 %492  ;;  %v2134_v21 = vpop.permute.xlu0 %456 }
 0x21a   :  { %v494_v7 = vsel %vm189_vm6, %v491_v6, %v2132_v20  ;;  %v463_v38 = vsel %vm176_vm7, %v2134_v21, %v459_v9  ;;  %v641_v9 = vrot.slane %v2151_v2, %v2195_v53 }
 0x21b   :  { %v517_v32 = vadd.f32 %v513_v23, %v494_v7  ;;  %v484_v46 = vadd.f32 %v477_v33, %v463_v38  ;;  %v713_v33 = vrot.slane %v2151_v2, %v2207_v5  ;;  %v717_v38 = vrot.slane %v2138_v22, %v2207_v5 }
 0x21d   :  { %v2142_v24 = vpop.permute.xlu1 %488  ;;  %v2146_v26 = vpop.permute.xlu0 %524  ;;  %v521_v45 = vmax.f32 %v485_v40, %v517_v32 }
 0x21e   :  { %v495_v31 = vsel %vm189_vm6, %v2142_v24, %v491_v6  ;;  %v531_v51 = vsel %vm202_vm5, %v2146_v26, %v527_v10 }
 0x21f   :  { %v516_v42 = vadd.f32 %v509_v27, %v495_v31  ;;  %v552_v60 = vadd.f32 %v545_v47, %v531_v51  ;;  %v677_v27 = vrot.slane %v2151_v2, %v2199_v57 }
 0x221   :  { %v2167_v34 = vpop.permute.xlu1 %528  ;;  %v2171_v37 = vpop.permute.xlu0 %564  ;;  %v520_v54 = vmax.f32 %v484_v46, %v516_v42 }
 0x222   :  { %v530_v39 = vsel %vm202_vm5, %v527_v10, %v2167_v34  ;;  %v566_v52 = vsel %vm215_vm4, %v563_v11, %v2171_v37 }
 0x223   :  { %v553_v43 = vadd.f32 %v549_v29, %v530_v39  ;;  %v589_v61 = vadd.f32 %v585_v48, %v566_v52  ;;  %v556_v10 = vmax.f32 %v520_v54, %v552_v60  ;;  %v612_v29 = vadd.f32 %v605_v58, %v1947_v1  ;;  %v1312_v54 = vld [vmem:[#allocation4 + $0x38] ss:$0 sm:$0xff] }
 0x225   :  { %v2185_v49 = vpop.permute.xlu1 %726  ;;  %v2187_v50 = vpop.permute.xlu0 %694  ;;  %v557_v55 = vmax.f32 %v521_v45, %v553_v43 }
 0x227   :  { %v593_v23 = vmax.f32 %v557_v55, %v589_v61 }
 0x229   :  { %v2205_v62 = vpop.permute.xlu1 %560  ;;  %v661_v63 = vpop.permute.xlu0 %660  ;;  %v617_v42 = vmax.f32 %v593_v23, %v613_v18  ;;  %v2247_v23 = vld [vmem:[#allocation4] sm:$0xff] }
 0x22a   :  { %v567_v6 = vsel %vm215_vm4, %v2205_v62, %v563_v11  ;;  %v681_v11 = vrot.slane %v2138_v22, %v2199_v57  ;;  %v662_v39 = vsel %vm241_vm2, %v2121_v14, %v661_v63  ;;  %v665_v1 = vsel %vm241_vm2, %v661_v63, %v2117_v12 }
 0x22b   :  { %v588_v7 = vadd.f32 %v581_v56, %v567_v6  ;;  %v684_v45 = vadd.f32 %v677_v27, %v662_v39  ;;  %v1311_v6 = vld [vmem:[#allocation4 + $0x30] ss:$0 sm:$0xff] }
 0x22c   :  { %v685_v46 = vadd.f32 %v681_v11, %v665_v1  ;;  %v501_v11 = vrot.slane %v2247_v23, %v2130_v19 }
 0x22d   :  { %v592_v30 = vmax.f32 %v556_v10, %v588_v7  ;;  %v625_v31 = vpop.permute.xlu1 %624  ;;  %v733_v32 = vpop.permute.xlu0 %732  ;;  %v2249_v7 = vld [vmem:[#allocation4 + $0x8] sm:$0xff] }
 0x22e   :  { %v626_v36 = vsel %vm228_vm3, %v2123_v15, %v625_v31  ;;  %v629_v40 = vsel %vm228_vm3, %v625_v31, %v2119_v13  ;;  %v737_v55 = vsel %vm267_vm0, %v733_v32, %v2185_v49  ;;  %v473_v18 = vrot.slane %v2249_v7, %v2136_v3 }
 0x22f   :  { %v616_v2 = vmax.f32 %v592_v30, %v612_v29  ;;  %v648_v43 = vadd.f32 %v641_v9, %v626_v36  ;;  %v649_v22 = vadd.f32 %v645_v0, %v629_v40  ;;  %v757_v9 = vadd.f32 %v1312_v54, %v737_v55 }
 0x230   :  { %v469_v29 = vrot.slane %v2247_v23, %v2136_v3  ;;  %v541_v40 = vrot.slane %v2249_v7, %v2144_v25  ;;  %v637_v55 = vrot.slane %v2249_v7, %v2195_v53 }
 0x231   :  { %v652_v47 = vmax.f32 %v616_v2, %v648_v43  ;;  %v653_v48 = vmax.f32 %v617_v42, %v649_v22  ;;  %v697_v51 = vpop.permute.xlu1 %696  ;;  %v455_v52 = vpop.permute.xlu0 %454  ;;  %v577_v42 = vrot.slane %v2249_v7, %v2169_v35 }
 0x232   :  { %v698_v56 = vsel %vm254_vm1, %v2187_v50, %v697_v51  ;;  %v701_v58 = vsel %vm254_vm1, %v697_v51, %v2127_v17  ;;  %v464_v1 = vsel %vm176_vm7, %v455_v52, %v2134_v21  ;;  %v465_v3 = vsel %vm176_vm7, %v2125_v16, %v455_v52 }
 0x233   :  { %v688_v59 = vmax.f32 %v652_v47, %v684_v45  ;;  %v689_v60 = vmax.f32 %v653_v48, %v685_v46  ;;  %v720_v61 = vadd.f32 %v713_v33, %v698_v56  ;;  %v721_v63 = vadd.f32 %v717_v38, %v701_v58 }
 0x234   :  { %v505_v38 = vrot.slane %v2249_v7, %v2130_v19  ;;  %v573_v19 = vrot.slane %v2247_v23, %v2169_v35  ;;  %v482_v22 = vadd.f32 %v469_v29, %v465_v3  ;;  %v483_v45 = vadd.f32 %v473_v18, %v464_v1  ;;  %v1309_v1 = vld [vmem:[#allocation4 + $0x20] ss:$0 sm:$0xff]  ;;  %v1310_v3 = vld [vmem:[#allocation4 + $0x28] ss:$0 sm:$0xff] }
 0x235   :  { %v725_v10 = vmax.f32 %v689_v60, %v721_v63  ;;  %v2251_v0 = vpop.permute.xlu1 %730  ;;  %v523_v27 = vpop.permute.xlu0 %522  ;;  %v724_v31 = vmax.f32 %v688_v59, %v720_v61  ;;  %v673_v29 = vrot.slane %v2249_v7, %v2199_v57 }
 0x236   :  { %v734_v30 = vsel %vm267_vm0, %v2251_v0, %v733_v32  ;;  %v537_v32 = vrot.slane %v2247_v23, %v2144_v25  ;;  %v532_v21 = vsel %vm202_vm5, %v523_v27, %v2146_v26  ;;  %v533_v16 = vsel %vm202_vm5, %v2167_v34, %v523_v27 }
 0x237   :  { %v756_v33 = vadd.f32 %v1311_v6, %v734_v30  ;;  %v761_v39 = vmax.f32 %v725_v10, %v757_v9  ;;  %v597_v26 = vrot.slane %v2247_v23, %v2179_v44  ;;  %v601_v34 = vrot.slane %v2249_v7, %v2179_v44 }
 0x238   :  { %v550_v48 = vadd.f32 %v537_v32, %v533_v16  ;;  %v551_v51 = vadd.f32 %v541_v40, %v532_v21 }
 0x239   :  { %v760_v36 = vmax.f32 %v724_v31, %v756_v33  ;;  %v487_v2 = vpop.permute.xlu1 %486  ;;  %896 = vmatprep.mubr.f32.mxu1 %v761_v39  ;;  %v621_v47 = vpop.permute.xlu0 %620  ;;  %v611_v6 = vadd.f32 %v601_v34, %v2000_v41  ;;  %v2356_v34 = vld [vmem:[%s2514_s4] sm:$0xff] }
 0x23a   :  { %v496_v25 = vsel %vm189_vm6, %v487_v2, %v2142_v24  ;;  %v497_v43 = vsel %vm189_vm6, %v2132_v20, %v487_v2  ;;  %v633_v20 = vrot.slane %v2247_v23, %v2195_v53  ;;  %v627_v63 = vsel %vm228_vm3, %v621_v47, %v2123_v15 }
 0x23b   :  { %v514_v46 = vadd.f32 %v501_v11, %v497_v43  ;;  %v515_v35 = vadd.f32 %v505_v38, %v496_v25  ;;  %897 = vmatmul.mubr.f32.vlgmr.msra.gmra.mxu1 %v760_v36  ;;  %v628_v53 = vsel %vm228_vm3, %v2119_v13, %v621_v47  ;;  %v705_v15 = vrot.slane %v2247_v23, %v2207_v5 }
 0x23c   :  { %v709_v13 = vrot.slane %v2249_v7, %v2207_v5  ;;  %v646_v30 = vadd.f32 %v633_v20, %v628_v53  ;;  %v647_v11 = vadd.f32 %v637_v55, %v627_v63  ;;  %1466 = vmatprep.mubr.msk.f32.mxu1 %vm1604_vm10, %v1597_v4  ;;  %v2364_v20 = vld [vmem:[#allocation2 + $0x30] sm:$0xff]  ;;  %v2376_v53 = vld [vmem:[#allocation2 + $0x18] sm:$0xff] }
 0x23d   :  { %v518_v52 = vmax.f32 %v482_v22, %v514_v46  ;;  %v519_v24 = vmax.f32 %v483_v45, %v515_v35  ;;  %v559_v54 = vpop.permute.xlu1 %558  ;;  %v693_v27 = vpop.permute.xlu0 %692 }
 0x23e   :  { %v568_v56 = vsel %vm215_vm4, %v559_v54, %v2205_v62  ;;  %v569_v58 = vsel %vm215_vm4, %v2171_v37, %v559_v54  ;;  %v610_v62 = vadd.f32 %v597_v26, %v1957_v28  ;;  %v669_v37 = vrot.slane %v2247_v23, %v2199_v57 }
 0x23f   :  { %v554_v44 = vmax.f32 %v518_v52, %v550_v48  ;;  %v555_v59 = vmax.f32 %v519_v24, %v551_v51  ;;  %v586_v60 = vadd.f32 %v573_v19, %v569_v58  ;;  %v587_v61 = vadd.f32 %v577_v42, %v568_v56  ;;  %v2359_v48 = vld [vmem:[#allocation2 + $0x40] sm:$0xff]  ;;  %v2361_v51 = vld [vmem:[#allocation2 + $0x38] sm:$0xff]  ;;  %v2367_v56 = vld [vmem:[#allocation2 + $0x28] sm:$0xff] }
 0x240   :  { %v699_v57 = vsel %vm254_vm1, %v693_v27, %v2187_v50  ;;  %v700_v5 = vsel %vm254_vm1, %v2127_v17, %v693_v27  ;;  %v1605_v26 = vmov 1   ;;  %v2383_v27 = vld [vmem:[#allocation2 + $0x8] sm:$0xff] }
 0x241   :  { %v590_v9 = vmax.f32 %v554_v44, %v586_v60  ;;  %v591_v10 = vmax.f32 %v555_v59, %v587_v61  ;;  %v657_v18 = vpop.permute.xlu1 %656  ;;  %v718_v50 = vadd.f32 %v705_v15, %v700_v5  ;;  %v719_v36 = vadd.f32 %v709_v13, %v699_v57  ;;  %1537 = vset.pattern.permute.xlu1 %v1605_v26  ;;  %v2372_v60 = vld [vmem:[#allocation2 + $0x20] sm:$0xff] }
 0x242   :  { %v663_v28 = vsel %vm241_vm2, %v657_v18, %v2121_v14  ;;  %v664_v41 = vsel %vm241_vm2, %v2117_v12, %v657_v18  ;;  %v2387_v18 = vld [vmem:[#allocation2] sm:$0xff]  ;;  %v1608_v5 = vmov 2  }
 0x243   :  { %v614_v31 = vmax.f32 %v590_v9, %v610_v62  ;;  %v615_v33 = vmax.f32 %v591_v10, %v611_v6  ;;  %v682_v38 = vadd.f32 %v669_v37, %v664_v41  ;;  %v683_v14 = vadd.f32 %v673_v29, %v663_v28  ;;  %v2379_v9 = vld [vmem:[#allocation2 + $0x10] sm:$0xff]  ;;  %v2396_v41 = vld [vmem:[%s2512_s2] sm:$0xff]  ;;  %1538 = vset.pattern.permute.xlu0 %v1608_v5 }
 0x245   :  { %v650_v23 = vmax.f32 %v614_v31, %v646_v30  ;;  %v651_v7 = vmax.f32 %v615_v33, %v647_v11  ;;  %v729_v39 = vpop.permute.xlu1 %728 }
 0x246   :  { %v735_v12 = vsel %vm267_vm0, %v729_v39, %v2251_v0  ;;  %v736_v32 = vsel %vm267_vm0, %v2185_v49, %v729_v39 }
 0x247   :  { %v686_v40 = vmax.f32 %v650_v23, %v682_v38  ;;  %v687_v2 = vmax.f32 %v651_v7, %v683_v14  ;;  %v754_v19 = vadd.f32 %v1309_v1, %v736_v32  ;;  %v755_v42 = vadd.f32 %v1310_v3, %v735_v12 }
 0x249   :  { %v722_v17 = vmax.f32 %v686_v40, %v718_v50  ;;  %v723_v21 = vmax.f32 %v687_v2, %v719_v36 }
 0x24b   :  { %v758_v16 = vmax.f32 %v722_v17, %v754_v19  ;;  %v759_v25 = vmax.f32 %v723_v21, %v755_v42 }
 0x24d   :  { %826 = vmatprep.mubr.f32.mxu0 %v759_v25 }
 0x24e   :  { %827 = vmatmul.mubr.f32.vlgmr.msra.gmra.mxu0 %v758_v16  ;;  %v2435_v16 = vld [vmem:[%s2513_s3] sm:$0xff] }
 0x24f   :  { %1445 = vmatprep.mubr.msk.f32.mxu0 %vm1604_vm10, %v1597_v4 }
 0x2fb   :  { %v1384_v43 = vpop.f32.mrf.mxu1 }
 0x2fd   :  { %v1385_v22 = vpop.f32.mrf.mxu1 }
 0x2fe   :  { %v1386_v45 = vadd.f32 %v1385_v22, %v1384_v43 }
 0x300   :  { %903 = vrot.lane.b32.xlu0 %v1386_v45, %s1600_s8 }
 0x30e   :  { %v1349_v0 = vpop.f32.mrf.mxu0 }
 0x310   :  { %v1350_v8 = vpop.f32.mrf.mxu0 }
 0x311   :  { %v1351_v49 = vadd.f32 %v1350_v8, %v1349_v0 }
 0x372   :  { %v904_v46 = vpop.permute.xlu0 %903 }
 0x373   :  { %v2338_v35 = vsel %vm906_vm9, %v1351_v49, %v904_v46 }
 0x374   :  { %v908_v47 = vmax.f32 %v2338_v35, 0.0 }
 0x376   :  { %921 = vrot.lane.b32.xlu0 %v908_v47, %s1601_s26  ;;  %923 = vrot.lane.b32.xlu1 %v908_v47, %s1602_s30  ;;  %v929_v62 = vmul.f32 %v908_v47, %v2372_v60 }
 0x37a   :  { %917 = vrot.lane.b32.xlu0 %v908_v47, %s1593_s10  ;;  %919 = vrot.lane.b32.xlu1 %v908_v47, %s1603_s0 }
 0x37e   :  { %913 = vrot.lane.b32.xlu0 %v908_v47, %s1606_s12  ;;  %915 = vrot.lane.b32.xlu1 %v908_v47, %s1594_s11 }
 0x382   :  { %909 = vrot.lane.b32.xlu0 %v908_v47, %s1607_s14  ;;  %911 = vrot.lane.b32.xlu1 %v908_v47, %s1586_s13 }
 0x386   :  { %159 = vperm.xlu1 %1537, %v2356_v34  }
 0x3e8   :  { %v922_v52 = vpop.permute.xlu0 %921  ;;  %v924_v24 = vpop.permute.xlu1 %923 }
 0x3e9   :  { %v933_v54 = vmul.f32 %v924_v24, %v2359_v48  ;;  %v932_v55 = vmul.f32 %v922_v52, %v2361_v51 }
 0x3eb   :  { %1428 = vmatpush3.msra.mxu0 %v933_v54 }
 0x3ec   :  { %v918_v58 = vpop.permute.xlu0 %917  ;;  %1429 = vmatprep.subr.mxu0 %v1597_v4  ;;  %v920_v44 = vpop.permute.xlu1 %919 }
 0x3ed   :  { %v931_v59 = vmul.f32 %v920_v44, %v2364_v20  ;;  %1430 = vmatpush3.msra.mxu0 %v932_v55  ;;  %v930_v61 = vmul.f32 %v918_v58, %v2367_v56 }
 0x3ee   :  { %1431 = vmatprep.subr.mxu0 %v1597_v4 }
 0x3ef   :  { %1432 = vmatpush3.msra.mxu0 %v931_v59 }
 0x3f0   :  { %v914_v63 = vpop.permute.xlu0 %913  ;;  %1433 = vmatprep.subr.mxu0 %v1597_v4  ;;  %v916_v6 = vpop.permute.xlu1 %915 }
 0x3f1   :  { %1434 = vmatpush3.msra.mxu0 %v930_v61  ;;  %v928_v10 = vmul.f32 %v916_v6, %v2376_v53  ;;  %v927_v29 = vmul.f32 %v914_v63, %v2379_v9 }
 0x3f2   :  { %1435 = vmatprep.subr.mxu0 %v1597_v4 }
 0x3f3   :  { %1436 = vmatpush3.msra.mxu0 %v929_v62 }
 0x3f4   :  { %v912_v37 = vpop.permute.xlu1 %911  ;;  %1437 = vmatprep.subr.mxu0 %v1597_v4  ;;  %v910_v15 = vpop.permute.xlu0 %909 }
 0x3f5   :  { %1438 = vmatpush3.msra.mxu0 %v928_v10  ;;  %v926_v13 = vmul.f32 %v912_v37, %v2383_v27  ;;  %v925_v28 = vmul.f32 %v910_v15, %v2387_v18 }
 0x3f6   :  { %1439 = vmatprep.subr.mxu0 %v1597_v4 }
 0x3f7   :  { %1440 = vmatpush3.msra.mxu0 %v927_v29 }
 0x3f8   :  { %1441 = vmatprep.subr.mxu0 %v1597_v4 }
 0x3f9   :  { %1442 = vmatpush3.msra.mxu0 %v926_v13 }
 0x3fa   :  { %1443 = vmatprep.subr.mxu0 %v1597_v4 }
 0x3fb   :  { %1444 = vmatpush3.msra.mxu0 %v925_v28 }
 0x3fc   :  { %1446 = vmatmul.mubr.msk.f32.vlgmr.msra.gmra.mxu0 %vm308_vm8, %v2396_v41  ;;  %1469 = vmatprep.subr.mxu0 %v1597_v4 }
 0x3fd   :  { %1487 = vmatprep.mubr.msk.f32.mxu0 %vm1604_vm10, %v1597_v4 }
 0x401   :  { %v2404_v30 = vpop.permute.xlu1 %159 }
 0x4bc   :  { %v1003_v11 = vpop.f32.mrf.mxu0 }
 0x4bd   :  { %v1004_v31 = vadd.f32 %v1003_v11, %v2404_v30 }
 0x4be   :  { %v1447_v33 = vpop.f32.mrf.mxu0 }
 0x4bf   :  { %v1007_v57 = vmax.f32 %v1004_v31, 0.0 }
 0x4c1   :  { %1020 = vrot.lane.b32.xlu1 %v1007_v57, %s1601_s26  ;;  %1022 = vrot.lane.b32.xlu0 %v1007_v57, %s1602_s30  ;;  %v1028_v36 = vmul.f32 %v1007_v57, %v2372_v60 }
 0x4c5   :  { %1016 = vrot.lane.b32.xlu1 %v1007_v57, %s1593_s10  ;;  %1018 = vrot.lane.b32.xlu0 %v1007_v57, %s1603_s0 }
 0x4c9   :  { %1012 = vrot.lane.b32.xlu1 %v1007_v57, %s1606_s12  ;;  %1014 = vrot.lane.b32.xlu0 %v1007_v57, %s1594_s11 }
 0x4cd   :  { %1008 = vrot.lane.b32.xlu1 %v1007_v57, %s1607_s14  ;;  %1010 = vrot.lane.b32.xlu0 %v1007_v57, %s1586_s13 }
 0x4d1   :  { %163 = vperm.xlu0 %1538, %v2356_v34  }
 0x533   :  { %v1021_v23 = vpop.permute.xlu1 %1020  ;;  %v1023_v7 = vpop.permute.xlu0 %1022 }
 0x534   :  { %v1032_v38 = vmul.f32 %v1023_v7, %v2359_v48  ;;  %v1031_v14 = vmul.f32 %v1021_v23, %v2361_v51 }
 0x536   :  { %1449 = vmatpush3.msra.mxu1 %v1032_v38 }
 0x537   :  { %v1017_v39 = vpop.permute.xlu1 %1016  ;;  %1450 = vmatprep.subr.mxu1 %v1597_v4  ;;  %v1019_v1 = vpop.permute.xlu0 %1018 }
 0x538   :  { %v1030_v3 = vmul.f32 %v1019_v1, %v2364_v20  ;;  %1451 = vmatpush3.msra.mxu1 %v1031_v14  ;;  %v1029_v12 = vmul.f32 %v1017_v39, %v2367_v56 }
 0x539   :  { %1452 = vmatprep.subr.mxu1 %v1597_v4 }
 0x53a   :  { %1453 = vmatpush3.msra.mxu1 %v1030_v3 }
 0x53b   :  { %v1013_v32 = vpop.permute.xlu1 %1012  ;;  %1454 = vmatprep.subr.mxu1 %v1597_v4  ;;  %v1015_v50 = vpop.permute.xlu0 %1014 }
 0x53c   :  { %1455 = vmatpush3.msra.mxu1 %v1029_v12  ;;  %v1027_v40 = vmul.f32 %v1015_v50, %v2376_v53  ;;  %v1026_v17 = vmul.f32 %v1013_v32, %v2379_v9 }
 0x53d   :  { %1456 = vmatprep.subr.mxu1 %v1597_v4 }
 0x53e   :  { %1457 = vmatpush3.msra.mxu1 %v1028_v36 }
 0x53f   :  { %v1011_v2 = vpop.permute.xlu0 %1010  ;;  %1458 = vmatprep.subr.mxu1 %v1597_v4  ;;  %v1009_v19 = vpop.permute.xlu1 %1008 }
 0x540   :  { %1459 = vmatpush3.msra.mxu1 %v1027_v40  ;;  %v1025_v42 = vmul.f32 %v1011_v2, %v2383_v27  ;;  %v1024_v21 = vmul.f32 %v1009_v19, %v2387_v18 }
 0x541   :  { %1460 = vmatprep.subr.mxu1 %v1597_v4 }
 0x542   :  { %1461 = vmatpush3.msra.mxu1 %v1026_v17 }
 0x543   :  { %1462 = vmatprep.subr.mxu1 %v1597_v4 }
 0x544   :  { %1463 = vmatpush3.msra.mxu1 %v1025_v42 }
 0x545   :  { %1464 = vmatprep.subr.mxu1 %v1597_v4 }
 0x546   :  { %1465 = vmatpush3.msra.mxu1 %v1024_v21 }
 0x547   :  { %1467 = vmatmul.mubr.msk.f32.vlgmr.msra.gmra.mxu1 %vm308_vm8, %v2435_v16  ;;  %1490 = vmatprep.subr.mxu1 %v1597_v4 }
 0x548   :  { %1508 = vmatprep.mubr.msk.f32.mxu1 %vm1604_vm10, %v1597_v4 }
 0x54c   :  { %v2443_v25 = vpop.permute.xlu0 %163 }
 0x607   :  { %v1102_v43 = vpop.f32.mrf.mxu1 }
 0x608   :  { %v1103_v22 = vadd.f32 %v1102_v43, %v2443_v25 }
 0x609   :  { %v1468_v45 = vpop.f32.mrf.mxu1 }
 0x60a   :  { %v2447_v0 = vadd.f32 %v1103_v22, %v2338_v35 }
 0x60c   :  { %v1107_v8 = vmax.f32 %v2447_v0, 0.0 }
 0x60e   :  { %1118 = vrot.lane.b32.xlu0 %v1107_v8, %s1603_s0  ;;  %1122 = vrot.lane.b32.xlu1 %v1107_v8, %s1602_s30  ;;  %v1128_v55 = vmul.f32 %v1107_v8, %v2372_v60 }
 0x612   :  { %1114 = vrot.lane.b32.xlu0 %v1107_v8, %s1594_s11  ;;  %1120 = vrot.lane.b32.xlu1 %v1107_v8, %s1601_s26 }
 0x616   :  { %1110 = vrot.lane.b32.xlu0 %v1107_v8, %s1586_s13  ;;  %1116 = vrot.lane.b32.xlu1 %v1107_v8, %s1593_s10 }
 0x61a   :  { %1112 = vrot.lane.b32.xlu1 %v1107_v8, %s1606_s12 }
 0x61e   :  { %1108 = vrot.lane.b32.xlu1 %v1107_v8, %s1607_s14 }
 0x680   :  { %v1123_v49 = vpop.permute.xlu1 %1122  ;;  %v1119_v35 = vpop.permute.xlu0 %1118 }
 0x681   :  { %v1132_v46 = vmul.f32 %v1123_v49, %v2359_v48  ;;  %v1130_v34 = vmul.f32 %v1119_v35, %v2364_v20 }
 0x683   :  { %1470 = vmatpush3.msra.mxu0 %v1132_v46 }
 0x684   :  { %v1121_v47 = vpop.permute.xlu1 %1120  ;;  %1471 = vmatprep.subr.mxu0 %v1597_v4  ;;  %v1115_v52 = vpop.permute.xlu0 %1114 }
 0x685   :  { %v1131_v26 = vmul.f32 %v1121_v47, %v2361_v51  ;;  %v1127_v44 = vmul.f32 %v1115_v52, %v2376_v53 }
 0x687   :  { %1472 = vmatpush3.msra.mxu0 %v1131_v26 }
 0x688   :  { %1473 = vmatprep.subr.mxu0 %v1597_v4  ;;  %v1117_v24 = vpop.permute.xlu1 %1116  ;;  %v1111_v59 = vpop.permute.xlu0 %1110 }
 0x689   :  { %v1129_v54 = vmul.f32 %v1117_v24, %v2367_v56  ;;  %1474 = vmatpush3.msra.mxu0 %v1130_v34  ;;  %v1125_v6 = vmul.f32 %v1111_v59, %v2383_v27 }
 0x68a   :  { %1475 = vmatprep.subr.mxu0 %v1597_v4 }
 0x68b   :  { %1476 = vmatpush3.msra.mxu0 %v1129_v54 }
 0x68c   :  { %1477 = vmatprep.subr.mxu0 %v1597_v4  ;;  %v1113_v58 = vpop.permute.xlu1 %1112 }
 0x68d   :  { %1478 = vmatpush3.msra.mxu0 %v1128_v55  ;;  %v1126_v61 = vmul.f32 %v1113_v58, %v2379_v9 }
 0x68e   :  { %1479 = vmatprep.subr.mxu0 %v1597_v4 }
 0x68f   :  { %1480 = vmatpush3.msra.mxu0 %v1127_v44 }
 0x690   :  { %v1109_v63 = vpop.permute.xlu1 %1108  ;;  %1481 = vmatprep.subr.mxu0 %v1597_v4 }
 0x691   :  { %1482 = vmatpush3.msra.mxu0 %v1126_v61  ;;  %v1124_v62 = vmul.f32 %v1109_v63, %v2387_v18 }
 0x692   :  { %1483 = vmatprep.subr.mxu0 %v1597_v4 }
 0x693   :  { %1484 = vmatpush3.msra.mxu0 %v1125_v6 }
 0x694   :  { %1485 = vmatprep.subr.mxu0 %v1597_v4 }
 0x695   :  { %1486 = vmatpush3.msra.mxu0 %v1124_v62 }
 0x696   :  { %1488 = vmatmul.mubr.msk.f32.vlgmr.msra.gmra.mxu0 %vm308_vm8, %v2396_v41 }
 0x756   :  { %v1199_v10 = vpop.f32.mrf.mxu0 }
 0x757   :  { %v1200_v37 = vadd.f32 %v1199_v10, %v2404_v30 }
 0x758   :  { %v1489_v29 = vpop.f32.mrf.mxu0 }
 0x759   :  { %v1203_v15 = vmax.f32 %v1200_v37, 0.0 }
 0x75b   :  { %1216 = vrot.lane.b32.xlu1 %v1203_v15, %s1601_s26  ;;  %1218 = vrot.lane.b32.xlu0 %v1203_v15, %s1602_s30 }
 0x75f   :  { %1212 = vrot.lane.b32.xlu1 %v1203_v15, %s1593_s10  ;;  %1214 = vrot.lane.b32.xlu0 %v1203_v15, %s1603_s0 }
 0x763   :  { %1208 = vrot.lane.b32.xlu1 %v1203_v15, %s1606_s12  ;;  %1210 = vrot.lane.b32.xlu0 %v1203_v15, %s1594_s11 }
 0x767   :  { %1204 = vrot.lane.b32.xlu1 %v1203_v15, %s1607_s14  ;;  %1206 = vrot.lane.b32.xlu0 %v1203_v15, %s1586_s13 }
 0x7cd   :  { %v1217_v13 = vpop.permute.xlu1 %1216  ;;  %v1219_v28 = vpop.permute.xlu0 %1218 }
 0x7ce   :  { %v1228_v41 = vmul.f32 %v1219_v28, %v2359_v48  ;;  %v1227_v30 = vmul.f32 %v1217_v13, %v2361_v51  ;;  %v1224_v48 = vmul.f32 %v1203_v15, %v2372_v60 }
 0x7d0   :  { %1491 = vmatpush3.msra.mxu1 %v1228_v41 }
 0x7d1   :  { %v1213_v11 = vpop.permute.xlu1 %1212  ;;  %1492 = vmatprep.subr.mxu1 %v1597_v4  ;;  %v1215_v31 = vpop.permute.xlu0 %1214 }
 0x7d2   :  { %v1226_v33 = vmul.f32 %v1215_v31, %v2364_v20  ;;  %1493 = vmatpush3.msra.mxu1 %v1227_v30  ;;  %v1225_v57 = vmul.f32 %v1213_v11, %v2367_v56 }
 0x7d3   :  { %1494 = vmatprep.subr.mxu1 %v1597_v4 }
 0x7d4   :  { %1495 = vmatpush3.msra.mxu1 %v1226_v33 }
 0x7d5   :  { %v1209_v5 = vpop.permute.xlu1 %1208  ;;  %1496 = vmatprep.subr.mxu1 %v1597_v4  ;;  %v1211_v23 = vpop.permute.xlu0 %1210 }
 0x7d6   :  { %1497 = vmatpush3.msra.mxu1 %v1225_v57  ;;  %v1223_v51 = vmul.f32 %v1211_v23, %v2376_v53  ;;  %v1222_v20 = vmul.f32 %v1209_v5, %v2379_v9 }
 0x7d7   :  { %1498 = vmatprep.subr.mxu1 %v1597_v4 }
 0x7d8   :  { %1499 = vmatpush3.msra.mxu1 %v1224_v48 }
 0x7d9   :  { %v1207_v7 = vpop.permute.xlu0 %1206  ;;  %1500 = vmatprep.subr.mxu1 %v1597_v4  ;;  %v1205_v56 = vpop.permute.xlu1 %1204 }
 0x7da   :  { %1501 = vmatpush3.msra.mxu1 %v1223_v51  ;;  %v1221_v38 = vmul.f32 %v1207_v7, %v2383_v27  ;;  %v1220_v60 = vmul.f32 %v1205_v56, %v2387_v18 }
 0x7db   :  { %1502 = vmatprep.subr.mxu1 %v1597_v4 }
 0x7dc   :  { %1503 = vmatpush3.msra.mxu1 %v1222_v20 }
 0x7dd   :  { %1504 = vmatprep.subr.mxu1 %v1597_v4 }
 0x7de   :  { %1505 = vmatpush3.msra.mxu1 %v1221_v38 }
 0x7df   :  { %1506 = vmatprep.subr.mxu1 %v1597_v4 }
 0x7e0   :  { %1507 = vmatpush3.msra.mxu1 %v1220_v60 }
 0x7e1   :  { %1509 = vmatmul.mubr.msk.f32.vlgmr.msra.gmra.mxu1 %vm308_vm8, %v2435_v16 }
 0x8a1   :  { %v1295_v53 = vpop.f32.mrf.mxu1 }
 0x8a2   :  { %v1296_v9 = vadd.f32 %v1295_v53, %v2443_v25 }
 0x8a3   :  { %v1510_v14 = vpop.f32.mrf.mxu1 }
 0x8a4   :  { %v1299_v39 = vadd.f32 %v1296_v9, %v2447_v0 }
 0x8a6   :  { %1300 = vst [vmem:[%s2519_s9] sm:$0xff] %v1299_v39 }
 0x8a7   :  { %1305 = vsyncpa [#allocation3], 1 }
 0x8a8   :  { %1306 = vsyncpa [#allocation5], 1 }

</bundles_post_ra>
